<compile_context>
chip_gen: v6e
topology: v6e:2x2x1
jax: 0.10.0
libtpu: 0.0.40
codegen_flags: <defaults>
</compile_context>

<pallas_src>
import jax
import jax.numpy as jnp
import numpy as np
from jax.experimental import pallas as pl
from jax.experimental.pallas import tpu as pltpu

LN_EPS = 1e-5
BN_EPS = 1e-5


# ----------------------------------------------------------------------------
# Kernel 1: GC context — attention pool + BOTH channel MLPs in one kernel.
#   per batch:  ctx = sum_hw softmax(x @ w_mask) * x
#               mul = MLP_mul(ctx), add = MLP_add(ctx)
#   (sigmoid(mul) is applied later in the fused cv2/cv3 kernel.)
# ----------------------------------------------------------------------------
def _gc_kernel(x_ref, wm_ref, bm_ref,
               w1m_ref, b1m_ref, gm_ref, bem_ref, w2m_ref, b2m_ref,
               w1a_ref, b1a_ref, ga_ref, bea_ref, w2a_ref, b2a_ref,
               mul_ref, add_ref):
    x = x_ref[0]                                                  # (HW, C)
    logits = jnp.sum(x * wm_ref[...], axis=1, keepdims=True)      # (HW, 1)
    logits = logits + bm_ref[...]
    m = jnp.max(logits, axis=0, keepdims=True)
    p = jnp.exp(logits - m)
    denom = jnp.sum(p, axis=0, keepdims=True)                     # (1, 1)
    attn = p * pl.reciprocal(denom)                               # (HW, 1)
    ctx = jnp.sum(x * attn, axis=0, keepdims=True)                # (1, C)

    def mlp(w1, b1, g, be, w2, b2):
        h = jnp.dot(ctx, w1[...], preferred_element_type=jnp.float32) + b1[...]
        mu = jnp.mean(h, axis=-1, keepdims=True)
        var = jnp.mean(jnp.square(h - mu), axis=-1, keepdims=True)
        hn = (h - mu) * jax.lax.rsqrt(var + LN_EPS) * g[...] + be[...]
        hr = jnp.maximum(hn, 0.0)
        return jnp.dot(hr, w2[...], preferred_element_type=jnp.float32) + b2[...]

    mul_ref[0] = mlp(w1m_ref, b1m_ref, gm_ref, bem_ref, w2m_ref, b2m_ref)
    add_ref[0] = mlp(w1a_ref, b1a_ref, ga_ref, bea_ref, w2a_ref, b2a_ref)


def gc_context(x3, gc_params):
    # x3: (B, HW, C) -> mul_t, add_t: (B, 1, C)
    B, HW, C = x3.shape
    mulp, addp = gc_params['mul'], gc_params['add']
    P = mulp['w1'].shape[1]
    vec = lambda a: a.reshape(1, -1)
    full = lambda shp: pl.BlockSpec(shp, lambda b: tuple(0 for _ in shp))
    return pl.pallas_call(
        _gc_kernel,
        out_shape=(jax.ShapeDtypeStruct((B, 1, C), jnp.float32),
                   jax.ShapeDtypeStruct((B, 1, C), jnp.float32)),
        grid=(B,),
        in_specs=[
            pl.BlockSpec((1, HW, C), lambda b: (b, 0, 0)),
            full((1, C)), full((1, 1)),
            # channel_mul MLP
            full((C, P)), full((1, P)), full((1, P)), full((1, P)),
            full((P, C)), full((1, C)),
            # channel_add MLP
            full((C, P)), full((1, P)), full((1, P)), full((1, P)),
            full((P, C)), full((1, C)),
        ],
        out_specs=(pl.BlockSpec((1, 1, C), lambda b: (b, 0, 0)),
                   pl.BlockSpec((1, 1, C), lambda b: (b, 0, 0))),
        compiler_params=pltpu.CompilerParams(dimension_semantics=("parallel",)),
    )(x3, gc_params['w_mask'].reshape(1, C), gc_params['b_mask'].reshape(1, 1),
      mulp['w1'], vec(mulp['b1']), vec(mulp['g']), vec(mulp['beta']),
      mulp['w2'], vec(mulp['b2']),
      addp['w1'], vec(addp['b1']), vec(addp['g']), vec(addp['beta']),
      addp['w2'], vec(addp['b2']))


# ----------------------------------------------------------------------------
# Kernel 2: cv1 + bottleneck.cv1 fused: two chained 1x1 conv + folded BN + SiLU.
#   Emits both y1 (residual source) and h (3x3-conv input) without an HBM
#   round-trip between the two tiny matmuls.
# ----------------------------------------------------------------------------
def _cv1_bneck_kernel(x_ref, w1_ref, s1_ref, b1_ref, wb_ref, sb_ref, bb_ref,
                      y1_ref, h_ref):
    y = jnp.dot(x_ref[...], w1_ref[...], preferred_element_type=jnp.float32)
    y = y * s1_ref[...] + b1_ref[...]
    y1 = y * jax.nn.sigmoid(y)                                    # SiLU
    y1_ref[...] = y1
    z = jnp.dot(y1, wb_ref[...], preferred_element_type=jnp.float32)
    z = z * sb_ref[...] + bb_ref[...]
    h_ref[...] = z * jax.nn.sigmoid(z)                            # SiLU


def cv1_bneck_cv1(x2d, w1, s1, b1, wb, sb, bb, tile_m=256):
    # x2d: (N, Cin); returns (y1, h), each (N, c_)
    N, cin = x2d.shape
    cmid = w1.shape[1]
    n_pad = pl.cdiv(N, tile_m) * tile_m
    xp = x2d if n_pad == N else jnp.pad(x2d, ((0, n_pad - N), (0, 0)))
    y1, h = pl.pallas_call(
        _cv1_bneck_kernel,
        out_shape=(jax.ShapeDtypeStruct((n_pad, cmid), jnp.float32),
                   jax.ShapeDtypeStruct((n_pad, cmid), jnp.float32)),
        grid=(n_pad // tile_m,),
        in_specs=[
            pl.BlockSpec((tile_m, cin), lambda i: (i, 0)),
            pl.BlockSpec((cin, cmid), lambda i: (0, 0)),
            pl.BlockSpec((1, cmid), lambda i: (0, 0)),
            pl.BlockSpec((1, cmid), lambda i: (0, 0)),
            pl.BlockSpec((cmid, cmid), lambda i: (0, 0)),
            pl.BlockSpec((1, cmid), lambda i: (0, 0)),
            pl.BlockSpec((1, cmid), lambda i: (0, 0)),
        ],
        out_specs=(pl.BlockSpec((tile_m, cmid), lambda i: (i, 0)),
                   pl.BlockSpec((tile_m, cmid), lambda i: (i, 0))),
        compiler_params=pltpu.CompilerParams(dimension_semantics=("parallel",)),
    )(xp, w1, s1.reshape(1, cmid), b1.reshape(1, cmid),
      wb, sb.reshape(1, cmid), bb.reshape(1, cmid))
    return y1[:N], h[:N]


# ----------------------------------------------------------------------------
# Kernel 3: 3x3 conv (pad=1) + folded BN + SiLU + residual add (Bottleneck cv2).
#   Works on a flat (HW + 2*(W+1), Cin) slab per batch: each of the 9 taps is a
#   contiguous row-shifted slice, masked on the left/right columns, fed to the
#   MXU and accumulated in a VMEM scratch.
# ----------------------------------------------------------------------------
def _make_conv3x3_kernel(H, W, cin, cout):
    HW = H * W
    PAD = W + 1

    def kernel(xe_ref, w_ref, s_ref, b_ref, res_ref, ml_ref, mr_ref,
               o_ref, acc_ref):
        xe = xe_ref[0]                                            # (HW+2*PAD, cin)
        ml = ml_ref[...]                                          # (HW, 1)
        mr = mr_ref[...]
        acc_ref[...] = jnp.zeros_like(acc_ref)
        for kh in range(3):
            for kw in range(3):
                off = (kh - 1) * W + (kw - 1)
                patch = xe[PAD + off:PAD + off + HW, :]           # (HW, cin)
                if kw == 0:
                    patch = patch * ml                            # need w-1 >= 0
                elif kw == 2:
                    patch = patch * mr                            # need w+1 <= W-1
                acc_ref[...] += jnp.dot(patch, w_ref[kh * 3 + kw],
                                        preferred_element_type=jnp.float32)
        y = acc_ref[...] * s_ref[...] + b_ref[...]
        y = y * jax.nn.sigmoid(y)                                 # SiLU
        o_ref[0] = res_ref[0] + y
    return kernel


def conv3x3_bn_silu_residual(h3, w9, scale, bias, res3, H, W):
    # h3, res3: (B, HW, C); w9: (9, Cin, Cout)
    B, HW, cin = h3.shape
    cout = w9.shape[-1]
    PAD = W + 1
    he = jnp.pad(h3, ((0, 0), (PAD, PAD), (0, 0)))                # small halo only
    col = jnp.arange(HW, dtype=jnp.int32) % W
    mask_l = (col >= 1).astype(jnp.float32).reshape(HW, 1)
    mask_r = (col <= W - 2).astype(jnp.float32).reshape(HW, 1)
    kernel = _make_conv3x3_kernel(H, W, cin, cout)
    return pl.pallas_call(
        kernel,
        out_shape=jax.ShapeDtypeStruct((B, HW, cout), jnp.float32),
        grid=(B,),
        in_specs=[
            pl.BlockSpec((1, HW + 2 * PAD, cin), lambda b: (b, 0, 0)),
            pl.BlockSpec((9, cin, cout), lambda b: (0, 0, 0)),
            pl.BlockSpec((1, cout), lambda b: (0, 0)),
            pl.BlockSpec((1, cout), lambda b: (0, 0)),
            pl.BlockSpec((1, HW, cout), lambda b: (b, 0, 0)),
            pl.BlockSpec((HW, 1), lambda b: (0, 0)),
            pl.BlockSpec((HW, 1), lambda b: (0, 0)),
        ],
        out_specs=pl.BlockSpec((1, HW, cout), lambda b: (b, 0, 0)),
        scratch_shapes=[pltpu.VMEM((HW, cout), jnp.float32)],
        compiler_params=pltpu.CompilerParams(dimension_semantics=("parallel",)),
    )(he, w9, scale.reshape(1, cout), bias.reshape(1, cout), res3, mask_l, mask_r)


# ----------------------------------------------------------------------------
# Kernel 4: GC fusion + cv2 + (virtual) concat + cv3, all fused:
#   gc  = x * sigmoid(mul) + add
#   y2  = SiLU(BN(gc @ W_cv2))
#   out = SiLU(BN(m_out @ W_cv3_top + y2 @ W_cv3_bot))
#   gc_out, y2 and the concat never touch HBM.
# ----------------------------------------------------------------------------
def _fuse_cv2_cv3_kernel(x_ref, mul_ref, add_ref, m_ref,
                         w2_ref, s2_ref, b2_ref,
                         w3a_ref, w3b_ref, s3_ref, b3_ref, o_ref):
    x = x_ref[0]                                                  # (T, C)
    gcv = x * jax.nn.sigmoid(mul_ref[0]) + add_ref[0]             # (T, C)
    y2 = jnp.dot(gcv, w2_ref[...], preferred_element_type=jnp.float32)
    y2 = y2 * s2_ref[...] + b2_ref[...]
    y2 = y2 * jax.nn.sigmoid(y2)                                  # SiLU
    pre = (jnp.dot(m_ref[0], w3a_ref[...], preferred_element_type=jnp.float32)
           + jnp.dot(y2, w3b_ref[...], preferred_element_type=jnp.float32))
    y = pre * s3_ref[...] + b3_ref[...]
    o_ref[0] = y * jax.nn.sigmoid(y)                              # SiLU


def fuse_cv2_cv3(x3, mul_t, add_t, m3, w2, s2, b2, w3_top, w3_bot, s3, b3,
                 tile_hw=128):
    B, HW, C = x3.shape
    c_ = w2.shape[1]
    c2 = w3_top.shape[1]
    if HW % tile_hw != 0:
        tile_hw = HW
    return pl.pallas_call(
        _fuse_cv2_cv3_kernel,
        out_shape=jax.ShapeDtypeStruct((B, HW, c2), jnp.float32),
        grid=(B, HW // tile_hw),
        in_specs=[
            pl.BlockSpec((1, tile_hw, C), lambda b, t: (b, t, 0)),
            pl.BlockSpec((1, 1, C), lambda b, t: (b, 0, 0)),
            pl.BlockSpec((1, 1, C), lambda b, t: (b, 0, 0)),
            pl.BlockSpec((1, tile_hw, c_), lambda b, t: (b, t, 0)),
            pl.BlockSpec((C, c_), lambda b, t: (0, 0)),
            pl.BlockSpec((1, c_), lambda b, t: (0, 0)),
            pl.BlockSpec((1, c_), lambda b, t: (0, 0)),
            pl.BlockSpec((c_, c2), lambda b, t: (0, 0)),
            pl.BlockSpec((c_, c2), lambda b, t: (0, 0)),
            pl.BlockSpec((1, c2), lambda b, t: (0, 0)),
            pl.BlockSpec((1, c2), lambda b, t: (0, 0)),
        ],
        out_specs=pl.BlockSpec((1, tile_hw, c2), lambda b, t: (b, t, 0)),
        compiler_params=pltpu.CompilerParams(
            dimension_semantics=("parallel", "parallel")),
    )(x3, mul_t, add_t, m3, w2,
      s2.reshape(1, c_), b2.reshape(1, c_),
      w3_top, w3_bot, s3.reshape(1, c2), b3.reshape(1, c2))


# ----------------------------------------------------------------------------
# Parameter construction (deterministic, synthetic)
# ----------------------------------------------------------------------------
def init_params(key, c1, c2, e=0.5):
    c_ = int(c2 * e)
    p = c1 // 4
    keys = iter(jax.random.split(key, 64))

    def nrm(shape, s=0.1):
        return jax.random.normal(next(keys), shape, jnp.float32) * s

    def bn(c):
        gamma = 1.0 + nrm((c,), 0.2)
        beta = nrm((c,), 0.1)
        mean = nrm((c,), 0.1)
        var = jax.random.uniform(next(keys), (c,), jnp.float32, 0.5, 1.5)
        scale = gamma / jnp.sqrt(var + BN_EPS)
        bias = beta - mean * scale
        return scale, bias

    def gc_mlp():
        return {'w1': nrm((c1, p)), 'b1': nrm((p,)),
                'g': 1.0 + nrm((p,), 0.2), 'beta': nrm((p,)),
                'w2': nrm((p, c1)), 'b2': nrm((c1,))}

    return {
        'gc': {'w_mask': nrm((c1,)), 'b_mask': nrm((1,)),
               'mul': gc_mlp(), 'add': gc_mlp()},
        'cv1': {'w': nrm((c1, c_)), 'bn': bn(c_)},
        'cv2': {'w': nrm((c1, c_)), 'bn': bn(c_)},
        'cv3': {'w': nrm((2 * c_, c2)), 'bn': bn(c2)},
        'bneck': {'cv1': {'w': nrm((c_, c_)), 'bn': bn(c_)},
                  'cv2': {'w': nrm((3, 3, c_, c_)), 'bn': bn(c_)}},
    }


# ----------------------------------------------------------------------------
# C3GC forward built from the 4 fused Pallas kernels
# ----------------------------------------------------------------------------
def c3gc_forward(params, x_nchw, tile_m=256, tile_hw=128):
    B, C, H, W = x_nchw.shape
    HW = H * W
    x = jnp.transpose(x_nchw, (0, 2, 3, 1)).astype(jnp.float32)    # (B,H,W,C)
    xf3 = x.reshape(B, HW, C)
    xf2 = x.reshape(B * HW, C)

    # --- ContextBlock2d: attention pool + both channel MLPs (1 kernel) ---
    mul_t, add_t = gc_context(xf3, params['gc'])                   # (B,1,C) each

    # --- cv1 + Bottleneck.cv1 fused (1 kernel) ---
    cv1, bn1 = params['cv1'], params['bneck']['cv1']
    y1, h = cv1_bneck_cv1(xf2, cv1['w'], cv1['bn'][0], cv1['bn'][1],
                          bn1['w'], bn1['bn'][0], bn1['bn'][1], tile_m=tile_m)
    c_ = y1.shape[-1]

    # --- Bottleneck.cv2: 3x3 conv + BN + SiLU + residual (1 kernel) ---
    bn2 = params['bneck']['cv2']
    m_out = conv3x3_bn_silu_residual(h.reshape(B, HW, c_),
                                     bn2['w'].reshape(9, c_, c_),
                                     bn2['bn'][0], bn2['bn'][1],
                                     y1.reshape(B, HW, c_), H, W)  # (B,HW,c_)

    # --- GC fuse + cv2 + concat + cv3 fused (1 kernel) ---
    cv2p, cv3p = params['cv2'], params['cv3']
    w3 = cv3p['w']
    out3 = fuse_cv2_cv3(xf3, mul_t, add_t, m_out,
                        cv2p['w'], cv2p['bn'][0], cv2p['bn'][1],
                        w3[:c_], w3[c_:], cv3p['bn'][0], cv3p['bn'][1],
                        tile_hw=tile_hw)                           # (B,HW,c2)
    c2 = out3.shape[-1]
    return jnp.transpose(out3.reshape(B, H, W, c2), (0, 3, 1, 2))  # NCHW


# ----------------------------------------------------------------------------
# Pure-JAX reference (mirrors PyTorch semantics) for correctness check
# ----------------------------------------------------------------------------
def reference_forward(params, x_nchw):
    x = jnp.transpose(x_nchw, (0, 2, 3, 1)).astype(jnp.float32)
    B, H, W, C = x.shape
    HW = H * W

    def pw(x2, w, scale, bias):
        y = x2 @ w
        y = y * scale[None, :] + bias[None, :]
        return y * jax.nn.sigmoid(y)

    def mlp(ctx, w1, b1, g, beta, w2, b2):
        h = ctx @ w1 + b1[None, :]
        mu = jnp.mean(h, -1, keepdims=True)
        var = jnp.mean((h - mu) ** 2, -1, keepdims=True)
        hn = (h - mu) / jnp.sqrt(var + LN_EPS) * g[None, :] + beta[None, :]
        return jnp.maximum(hn, 0.0) @ w2 + b2[None, :]

    gc = params['gc']
    xf = x.reshape(B, HW, C)
    logits = jnp.einsum('bnc,c->bn', xf, gc['w_mask']) + gc['b_mask'][0]
    attn = jax.nn.softmax(logits, axis=-1)
    ctx = jnp.einsum('bnc,bn->bc', xf, attn)
    mul_t = jax.nn.sigmoid(mlp(ctx, **gc['mul']))
    add_t = mlp(ctx, **gc['add'])
    gc_out = xf * mul_t[:, None, :] + add_t[:, None, :]

    cv1 = params['cv1']
    y1 = pw(xf.reshape(-1, C), cv1['w'], *cv1['bn'])
    c_ = y1.shape[-1]
    b1 = params['bneck']['cv1']
    h = pw(y1, b1['w'], *b1['bn'])
    b2 = params['bneck']['cv2']
    hp = jnp.pad(h.reshape(B, H, W, c_), ((0, 0), (1, 1), (1, 1), (0, 0)))
    conv = jnp.zeros((B, H, W, c_), jnp.float32)
    for kh in range(3):
        for kw in range(3):
            conv = conv + jnp.einsum('bhwc,cd->bhwd',
                                     hp[:, kh:kh + H, kw:kw + W, :],
                                     b2['w'][kh, kw])
    s, bb = b2['bn']
    yb = conv * s + bb
    yb = yb * jax.nn.sigmoid(yb)
    m_out = y1.reshape(B, H, W, c_) + yb

    cv2p = params['cv2']
    y2 = pw(gc_out.reshape(-1, C), cv2p['w'], *cv2p['bn'])
    cat = jnp.concatenate([m_out.reshape(-1, c_), y2], axis=-1)
    cv3p = params['cv3']
    out = pw(cat, cv3p['w'], *cv3p['bn'])
    c2 = out.shape[-1]
    return jnp.transpose(out.reshape(B, H, W, c2), (0, 3, 1, 2))


if __name__ == "__main__":
    key = jax.random.PRNGKey(0)
    kx, kp = jax.random.split(key)
    B, c1, H, W = 2, 16, 16, 16
    c2 = 16
    x = jax.random.normal(kx, (B, c1, H, W), jnp.float32)
    params = init_params(kp, c1, c2, e=0.5)

    out = jax.block_until_ready(c3gc_forward(params, x))
    ref = jax.block_until_ready(reference_forward(params, x))

    assert out.shape == (B, c2, H, W), out.shape
    np.testing.assert_allclose(np.asarray(out), np.asarray(ref),
                               atol=2e-3, rtol=2e-3)
    print("KERNEL_OK")
</pallas_src>

<mosaic_0001>
module attributes {stable_mosaic.version = 11 : i64} {
  func.func @_gc_kernel(%arg0: i32, %arg1: memref<1x256x16xf32, #tpu.memory_space<vmem>>, %arg2: memref<1x16xf32, #tpu.memory_space<vmem>>, %arg3: memref<1x1xf32, #tpu.memory_space<vmem>>, %arg4: memref<16x4xf32, #tpu.memory_space<vmem>>, %arg5: memref<1x4xf32, #tpu.memory_space<vmem>>, %arg6: memref<1x4xf32, #tpu.memory_space<vmem>>, %arg7: memref<1x4xf32, #tpu.memory_space<vmem>>, %arg8: memref<4x16xf32, #tpu.memory_space<vmem>>, %arg9: memref<1x16xf32, #tpu.memory_space<vmem>>, %arg10: memref<16x4xf32, #tpu.memory_space<vmem>>, %arg11: memref<1x4xf32, #tpu.memory_space<vmem>>, %arg12: memref<1x4xf32, #tpu.memory_space<vmem>>, %arg13: memref<1x4xf32, #tpu.memory_space<vmem>>, %arg14: memref<4x16xf32, #tpu.memory_space<vmem>>, %arg15: memref<1x16xf32, #tpu.memory_space<vmem>>, %arg16: memref<1x1x16xf32, #tpu.memory_space<vmem>>, %arg17: memref<1x1x16xf32, #tpu.memory_space<vmem>>) attributes {dimension_semantics = [#tpu.dimension_semantics<parallel>], iteration_bounds = array<i64: 2>, scalar_prefetch = 0 : i64, scratch_operands = 0 : i64, tpu.core_type = #tpu.core_type<tc>, window_params = [{transform_indices = @transform_0, window_bounds = array<i64: 1, 256, 16>}, {pipeline_mode = #tpu.pipeline_mode<synchronous>, transform_indices = @transform_1, window_bounds = array<i64: 1, 16>}, {pipeline_mode = #tpu.pipeline_mode<synchronous>, transform_indices = @transform_2, window_bounds = array<i64: 1, 1>}, {pipeline_mode = #tpu.pipeline_mode<synchronous>, transform_indices = @transform_3, window_bounds = array<i64: 16, 4>}, {pipeline_mode = #tpu.pipeline_mode<synchronous>, transform_indices = @transform_4, window_bounds = array<i64: 1, 4>}, {pipeline_mode = #tpu.pipeline_mode<synchronous>, transform_indices = @transform_5, window_bounds = array<i64: 1, 4>}, {pipeline_mode = #tpu.pipeline_mode<synchronous>, transform_indices = @transform_6, window_bounds = array<i64: 1, 4>}, {pipeline_mode = #tpu.pipeline_mode<synchronous>, transform_indices = @transform_7, window_bounds = array<i64: 4, 16>}, {pipeline_mode = #tpu.pipeline_mode<synchronous>, transform_indices = @transform_8, window_bounds = array<i64: 1, 16>}, {pipeline_mode = #tpu.pipeline_mode<synchronous>, transform_indices = @transform_9, window_bounds = array<i64: 16, 4>}, {pipeline_mode = #tpu.pipeline_mode<synchronous>, transform_indices = @transform_10, window_bounds = array<i64: 1, 4>}, {pipeline_mode = #tpu.pipeline_mode<synchronous>, transform_indices = @transform_11, window_bounds = array<i64: 1, 4>}, {pipeline_mode = #tpu.pipeline_mode<synchronous>, transform_indices = @transform_12, window_bounds = array<i64: 1, 4>}, {pipeline_mode = #tpu.pipeline_mode<synchronous>, transform_indices = @transform_13, window_bounds = array<i64: 4, 16>}, {pipeline_mode = #tpu.pipeline_mode<synchronous>, transform_indices = @transform_14, window_bounds = array<i64: 1, 16>}, {transform_indices = @transform_15, window_bounds = array<i64: 1, 1, 16>}, {transform_indices = @transform_16, window_bounds = array<i64: 1, 1, 16>}]} {
    %c0 = arith.constant 0 : index
    %c0_0 = arith.constant 0 : index
    %c0_1 = arith.constant 0 : index
    %0 = vector.load %arg1[%c0, %c0_0, %c0_1] : memref<1x256x16xf32, #tpu.memory_space<vmem>>, vector<1x256x16xf32>
    %1 = vector.shape_cast %0 : vector<1x256x16xf32> to vector<256x16xf32>
    %c0_2 = arith.constant 0 : index
    %c0_3 = arith.constant 0 : index
    %2 = vector.load %arg2[%c0_2, %c0_3] : memref<1x16xf32, #tpu.memory_space<vmem>>, vector<1x16xf32>
    %3 = vector.broadcast %2 : vector<1x16xf32> to vector<256x16xf32>
    %4 = arith.mulf %1, %3 : vector<256x16xf32>
    %cst = arith.constant dense<0.000000e+00> : vector<256xf32>
    %5 = vector.multi_reduction <add>, %4, %cst [1] : vector<256x16xf32> to vector<256xf32>
    %6 = vector.shape_cast %5 : vector<256xf32> to vector<256x1xf32>
    %c0_4 = arith.constant 0 : index
    %c0_5 = arith.constant 0 : index
    %7 = vector.load %arg3[%c0_4, %c0_5] : memref<1x1xf32, #tpu.memory_space<vmem>>, vector<1x1xf32>
    %8 = vector.broadcast %7 : vector<1x1xf32> to vector<256x1xf32>
    %9 = arith.addf %6, %8 : vector<256x1xf32>
    %cst_6 = arith.constant dense<0xFF800000> : vector<1xf32>
    %10 = vector.multi_reduction <maximumf>, %9, %cst_6 [0] : vector<256x1xf32> to vector<1xf32>
    %11 = vector.shape_cast %10 : vector<1xf32> to vector<1x1xf32>
    %12 = vector.broadcast %11 : vector<1x1xf32> to vector<256x1xf32>
    %13 = arith.subf %9, %12 : vector<256x1xf32>
    %14 = math.exp %13 : vector<256x1xf32>
    %cst_7 = arith.constant dense<0.000000e+00> : vector<1xf32>
    %15 = vector.multi_reduction <add>, %14, %cst_7 [0] : vector<256x1xf32> to vector<1xf32>
    %16 = vector.shape_cast %15 : vector<1xf32> to vector<1x1xf32>
    %17 = tpu.reciprocal %16 : vector<1x1xf32> -> vector<1x1xf32>
    %18 = vector.broadcast %17 : vector<1x1xf32> to vector<256x1xf32>
    %19 = arith.mulf %14, %18 : vector<256x1xf32>
    %20 = vector.broadcast %19 : vector<256x1xf32> to vector<256x16xf32>
    %21 = arith.mulf %1, %20 : vector<256x16xf32>
    %cst_8 = arith.constant dense<0.000000e+00> : vector<16xf32>
    %22 = vector.multi_reduction <add>, %21, %cst_8 [0] : vector<256x16xf32> to vector<16xf32>
    %23 = vector.shape_cast %22 : vector<16xf32> to vector<1x16xf32>
    %c0_9 = arith.constant 0 : index
    %c0_10 = arith.constant 0 : index
    %24 = vector.load %arg4[%c0_9, %c0_10] : memref<16x4xf32, #tpu.memory_space<vmem>>, vector<16x4xf32>
    %cst_11 = arith.constant dense<0.000000e+00> : vector<1x4xf32>
    %25 = tpu.matmul %23, %24, %cst_11 {dimension_numbers = #tpu.dot_dimension_numbers<[1], [0], [0], [1], [0, 0, 1, 1], [], []>} : vector<1x16xf32>, vector<16x4xf32>, vector<1x4xf32> -> vector<1x4xf32>
    %c0_12 = arith.constant 0 : index
    %c0_13 = arith.constant 0 : index
    %26 = vector.load %arg5[%c0_12, %c0_13] : memref<1x4xf32, #tpu.memory_space<vmem>>, vector<1x4xf32>
    %27 = arith.addf %25, %26 : vector<1x4xf32>
    %cst_14 = arith.constant dense<0.000000e+00> : vector<1xf32>
    %28 = vector.multi_reduction <add>, %27, %cst_14 [1] : vector<1x4xf32> to vector<1xf32>
    %29 = vector.shape_cast %28 : vector<1xf32> to vector<1x1xf32>
    %cst_15 = arith.constant 4.000000e+00 : f32
    %30 = vector.broadcast %cst_15 : f32 to vector<1x1xf32>
    %31 = arith.divf %29, %30 : vector<1x1xf32>
    %32 = vector.broadcast %31 : vector<1x1xf32> to vector<1x4xf32>
    %33 = arith.subf %27, %32 : vector<1x4xf32>
    %34 = arith.mulf %33, %33 : vector<1x4xf32>
    %cst_16 = arith.constant dense<0.000000e+00> : vector<1xf32>
    %35 = vector.multi_reduction <add>, %34, %cst_16 [1] : vector<1x4xf32> to vector<1xf32>
    %36 = vector.shape_cast %35 : vector<1xf32> to vector<1x1xf32>
    %cst_17 = arith.constant 4.000000e+00 : f32
    %37 = vector.broadcast %cst_17 : f32 to vector<1x1xf32>
    %38 = arith.divf %36, %37 : vector<1x1xf32>
    %39 = vector.broadcast %31 : vector<1x1xf32> to vector<1x4xf32>
    %40 = arith.subf %27, %39 : vector<1x4xf32>
    %cst_18 = arith.constant 9.99999974E-6 : f32
    %41 = vector.broadcast %cst_18 : f32 to vector<1x1xf32>
    %42 = arith.addf %38, %41 : vector<1x1xf32>
    %43 = math.rsqrt %42 : vector<1x1xf32>
    %44 = vector.broadcast %43 : vector<1x1xf32> to vector<1x4xf32>
    %45 = arith.mulf %40, %44 : vector<1x4xf32>
    %c0_19 = arith.constant 0 : index
    %c0_20 = arith.constant 0 : index
    %46 = vector.load %arg6[%c0_19, %c0_20] : memref<1x4xf32, #tpu.memory_space<vmem>>, vector<1x4xf32>
    %47 = arith.mulf %45, %46 : vector<1x4xf32>
    %c0_21 = arith.constant 0 : index
    %c0_22 = arith.constant 0 : index
    %48 = vector.load %arg7[%c0_21, %c0_22] : memref<1x4xf32, #tpu.memory_space<vmem>>, vector<1x4xf32>
    %49 = arith.addf %47, %48 : vector<1x4xf32>
    %cst_23 = arith.constant 0.000000e+00 : f32
    %50 = vector.broadcast %cst_23 : f32 to vector<1x4xf32>
    %51 = arith.maximumf %49, %50 : vector<1x4xf32>
    %c0_24 = arith.constant 0 : index
    %c0_25 = arith.constant 0 : index
    %52 = vector.load %arg8[%c0_24, %c0_25] : memref<4x16xf32, #tpu.memory_space<vmem>>, vector<4x16xf32>
    %cst_26 = arith.constant dense<0.000000e+00> : vector<1x16xf32>
    %53 = tpu.matmul %51, %52, %cst_26 {dimension_numbers = #tpu.dot_dimension_numbers<[1], [0], [0], [1], [0, 0, 1, 1], [], []>} : vector<1x4xf32>, vector<4x16xf32>, vector<1x16xf32> -> vector<1x16xf32>
    %c0_27 = arith.constant 0 : index
    %c0_28 = arith.constant 0 : index
    %54 = vector.load %arg9[%c0_27, %c0_28] : memref<1x16xf32, #tpu.memory_space<vmem>>, vector<1x16xf32>
    %55 = arith.addf %53, %54 : vector<1x16xf32>
    %c0_29 = arith.constant 0 : index
    %c0_30 = arith.constant 0 : index
    %c0_31 = arith.constant 0 : index
    %56 = vector.load %arg16[%c0_29, %c0_30, %c0_31] : memref<1x1x16xf32, #tpu.memory_space<vmem>>, vector<1x1x16xf32>
    %57 = vector.shape_cast %56 : vector<1x1x16xf32> to vector<1x16xf32>
    %58 = vector.shape_cast %55 : vector<1x16xf32> to vector<1x1x16xf32>
    tpu.vector_store %arg16[%c0_29, %c0_30, %c0_31], %58 {strides = array<i32>} : memref<1x1x16xf32, #tpu.memory_space<vmem>>, vector<1x1x16xf32>,
    %c0_32 = arith.constant 0 : index
    %c0_33 = arith.constant 0 : index
    %59 = vector.load %arg10[%c0_32, %c0_33] : memref<16x4xf32, #tpu.memory_space<vmem>>, vector<16x4xf32>
    %cst_34 = arith.constant dense<0.000000e+00> : vector<1x4xf32>
    %60 = tpu.matmul %23, %59, %cst_34 {dimension_numbers = #tpu.dot_dimension_numbers<[1], [0], [0], [1], [0, 0, 1, 1], [], []>} : vector<1x16xf32>, vector<16x4xf32>, vector<1x4xf32> -> vector<1x4xf32>
    %c0_35 = arith.constant 0 : index
    %c0_36 = arith.constant 0 : index
    %61 = vector.load %arg11[%c0_35, %c0_36] : memref<1x4xf32, #tpu.memory_space<vmem>>, vector<1x4xf32>
    %62 = arith.addf %60, %61 : vector<1x4xf32>
    %cst_37 = arith.constant dense<0.000000e+00> : vector<1xf32>
    %63 = vector.multi_reduction <add>, %62, %cst_37 [1] : vector<1x4xf32> to vector<1xf32>
    %64 = vector.shape_cast %63 : vector<1xf32> to vector<1x1xf32>
    %cst_38 = arith.constant 4.000000e+00 : f32
    %65 = vector.broadcast %cst_38 : f32 to vector<1x1xf32>
    %66 = arith.divf %64, %65 : vector<1x1xf32>
    %67 = vector.broadcast %66 : vector<1x1xf32> to vector<1x4xf32>
    %68 = arith.subf %62, %67 : vector<1x4xf32>
    %69 = arith.mulf %68, %68 : vector<1x4xf32>
    %cst_39 = arith.constant dense<0.000000e+00> : vector<1xf32>
    %70 = vector.multi_reduction <add>, %69, %cst_39 [1] : vector<1x4xf32> to vector<1xf32>
    %71 = vector.shape_cast %70 : vector<1xf32> to vector<1x1xf32>
    %cst_40 = arith.constant 4.000000e+00 : f32
    %72 = vector.broadcast %cst_40 : f32 to vector<1x1xf32>
    %73 = arith.divf %71, %72 : vector<1x1xf32>
    %74 = vector.broadcast %66 : vector<1x1xf32> to vector<1x4xf32>
    %75 = arith.subf %62, %74 : vector<1x4xf32>
    %cst_41 = arith.constant 9.99999974E-6 : f32
    %76 = vector.broadcast %cst_41 : f32 to vector<1x1xf32>
    %77 = arith.addf %73, %76 : vector<1x1xf32>
    %78 = math.rsqrt %77 : vector<1x1xf32>
    %79 = vector.broadcast %78 : vector<1x1xf32> to vector<1x4xf32>
    %80 = arith.mulf %75, %79 : vector<1x4xf32>
    %c0_42 = arith.constant 0 : index
    %c0_43 = arith.constant 0 : index
    %81 = vector.load %arg12[%c0_42, %c0_43] : memref<1x4xf32, #tpu.memory_space<vmem>>, vector<1x4xf32>
    %82 = arith.mulf %80, %81 : vector<1x4xf32>
    %c0_44 = arith.constant 0 : index
    %c0_45 = arith.constant 0 : index
    %83 = vector.load %arg13[%c0_44, %c0_45] : memref<1x4xf32, #tpu.memory_space<vmem>>, vector<1x4xf32>
    %84 = arith.addf %82, %83 : vector<1x4xf32>
    %cst_46 = arith.constant 0.000000e+00 : f32
    %85 = vector.broadcast %cst_46 : f32 to vector<1x4xf32>
    %86 = arith.maximumf %84, %85 : vector<1x4xf32>
    %c0_47 = arith.constant 0 : index
    %c0_48 = arith.constant 0 : index
    %87 = vector.load %arg14[%c0_47, %c0_48] : memref<4x16xf32, #tpu.memory_space<vmem>>, vector<4x16xf32>
    %cst_49 = arith.constant dense<0.000000e+00> : vector<1x16xf32>
    %88 = tpu.matmul %86, %87, %cst_49 {dimension_numbers = #tpu.dot_dimension_numbers<[1], [0], [0], [1], [0, 0, 1, 1], [], []>} : vector<1x4xf32>, vector<4x16xf32>, vector<1x16xf32> -> vector<1x16xf32>
    %c0_50 = arith.constant 0 : index
    %c0_51 = arith.constant 0 : index
    %89 = vector.load %arg15[%c0_50, %c0_51] : memref<1x16xf32, #tpu.memory_space<vmem>>, vector<1x16xf32>
    %90 = arith.addf %88, %89 : vector<1x16xf32>
    %c0_52 = arith.constant 0 : index
    %c0_53 = arith.constant 0 : index
    %c0_54 = arith.constant 0 : index
    %91 = vector.load %arg17[%c0_52, %c0_53, %c0_54] : memref<1x1x16xf32, #tpu.memory_space<vmem>>, vector<1x1x16xf32>
    %92 = vector.shape_cast %91 : vector<1x1x16xf32> to vector<1x16xf32>
    %93 = vector.shape_cast %90 : vector<1x16xf32> to vector<1x1x16xf32>
    tpu.vector_store %arg17[%c0_52, %c0_53, %c0_54], %93 {strides = array<i32>} : memref<1x1x16xf32, #tpu.memory_space<vmem>>, vector<1x1x16xf32>,
    return
  }
  func.func @transform_0(%arg0: i32) -> (i32, i32, i32) {
    %c0_i32 = arith.constant 0 : i32
    %c0_i32_0 = arith.constant 0 : i32
    %c0_i32_1 = arith.constant 0 : i32
    return %arg0, %c0_i32, %c0_i32_0 : i32, i32, i32
  }
  func.func @transform_1(%arg0: i32) -> (i32, i32) {
    %c0_i32 = arith.constant 0 : i32
    %c0_i32_0 = arith.constant 0 : i32
    %c0_i32_1 = arith.constant 0 : i32
    return %c0_i32, %c0_i32_0 : i32, i32
  }
  func.func @transform_2(%arg0: i32) -> (i32, i32) {
    %c0_i32 = arith.constant 0 : i32
    %c0_i32_0 = arith.constant 0 : i32
    %c0_i32_1 = arith.constant 0 : i32
    return %c0_i32, %c0_i32_0 : i32, i32
  }
  func.func @transform_3(%arg0: i32) -> (i32, i32) {
    %c0_i32 = arith.constant 0 : i32
    %c0_i32_0 = arith.constant 0 : i32
    %c0_i32_1 = arith.constant 0 : i32
    return %c0_i32, %c0_i32_0 : i32, i32
  }
  func.func @transform_4(%arg0: i32) -> (i32, i32) {
    %c0_i32 = arith.constant 0 : i32
    %c0_i32_0 = arith.constant 0 : i32
    %c0_i32_1 = arith.constant 0 : i32
    return %c0_i32, %c0_i32_0 : i32, i32
  }
  func.func @transform_5(%arg0: i32) -> (i32, i32) {
    %c0_i32 = arith.constant 0 : i32
    %c0_i32_0 = arith.constant 0 : i32
    %c0_i32_1 = arith.constant 0 : i32
    return %c0_i32, %c0_i32_0 : i32, i32
  }
  func.func @transform_6(%arg0: i32) -> (i32, i32) {
    %c0_i32 = arith.constant 0 : i32
    %c0_i32_0 = arith.constant 0 : i32
    %c0_i32_1 = arith.constant 0 : i32
    return %c0_i32, %c0_i32_0 : i32, i32
  }
  func.func @transform_7(%arg0: i32) -> (i32, i32) {
    %c0_i32 = arith.constant 0 : i32
    %c0_i32_0 = arith.constant 0 : i32
    %c0_i32_1 = arith.constant 0 : i32
    return %c0_i32, %c0_i32_0 : i32, i32
  }
  func.func @transform_8(%arg0: i32) -> (i32, i32) {
    %c0_i32 = arith.constant 0 : i32
    %c0_i32_0 = arith.constant 0 : i32
    %c0_i32_1 = arith.constant 0 : i32
    return %c0_i32, %c0_i32_0 : i32, i32
  }
  func.func @transform_9(%arg0: i32) -> (i32, i32) {
    %c0_i32 = arith.constant 0 : i32
    %c0_i32_0 = arith.constant 0 : i32
    %c0_i32_1 = arith.constant 0 : i32
    return %c0_i32, %c0_i32_0 : i32, i32
  }
  func.func @transform_10(%arg0: i32) -> (i32, i32) {
    %c0_i32 = arith.constant 0 : i32
    %c0_i32_0 = arith.constant 0 : i32
    %c0_i32_1 = arith.constant 0 : i32
    return %c0_i32, %c0_i32_0 : i32, i32
  }
  func.func @transform_11(%arg0: i32) -> (i32, i32) {
    %c0_i32 = arith.constant 0 : i32
    %c0_i32_0 = arith.constant 0 : i32
    %c0_i32_1 = arith.constant 0 : i32
    return %c0_i32, %c0_i32_0 : i32, i32
  }
  func.func @transform_12(%arg0: i32) -> (i32, i32) {
    %c0_i32 = arith.constant 0 : i32
    %c0_i32_0 = arith.constant 0 : i32
    %c0_i32_1 = arith.constant 0 : i32
    return %c0_i32, %c0_i32_0 : i32, i32
  }
  func.func @transform_13(%arg0: i32) -> (i32, i32) {
    %c0_i32 = arith.constant 0 : i32
    %c0_i32_0 = arith.constant 0 : i32
    %c0_i32_1 = arith.constant 0 : i32
    return %c0_i32, %c0_i32_0 : i32, i32
  }
  func.func @transform_14(%arg0: i32) -> (i32, i32) {
    %c0_i32 = arith.constant 0 : i32
    %c0_i32_0 = arith.constant 0 : i32
    %c0_i32_1 = arith.constant 0 : i32
    return %c0_i32, %c0_i32_0 : i32, i32
  }
  func.func @transform_15(%arg0: i32) -> (i32, i32, i32) {
    %c0_i32 = arith.constant 0 : i32
    %c0_i32_0 = arith.constant 0 : i32
    %c0_i32_1 = arith.constant 0 : i32
    return %arg0, %c0_i32, %c0_i32_0 : i32, i32, i32
  }
  func.func @transform_16(%arg0: i32) -> (i32, i32, i32) {
    %c0_i32 = arith.constant 0 : i32
    %c0_i32_0 = arith.constant 0 : i32
    %c0_i32_1 = arith.constant 0 : i32
    return %arg0, %c0_i32, %c0_i32_0 : i32, i32, i32
  }
}

</mosaic_0001>

<bundles_post_ra>
// kernel: tpu_custom_call.1
= control target key start
LH: loop header
LB: loop body
LE: loop exit
PB: predicated region body
PF: predicated region fallthrough
CT: control target
= control target key end

     0   :  { %s2896_s0 = inlined_call_operand.vmem [shape: f32[2,256,16], index: 0, kind: input, shape index: {}]   ;;  %s2897_s1 = inlined_call_operand.vmem [shape: f32[1,16], index: 1, kind: input, shape index: {}]   ;;  %s2898_s2 = inlined_call_operand.<no memory space> [shape: f32[1,1], index: 2, kind: input, shape index: {}]   ;;  %s2899_s3 = inlined_call_operand.vmem [shape: f32[16,4], index: 3, kind: input, shape index: {}]   ;;  %s2900_s4 = inlined_call_operand.vmem [shape: f32[1,4], index: 4, kind: input, shape index: {}]   ;;  %s2901_s5 = inlined_call_operand.vmem [shape: f32[1,4], index: 5, kind: input, shape index: {}]   ;;  %s2902_s6 = inlined_call_operand.vmem [shape: f32[1,4], index: 6, kind: input, shape index: {}]   ;;  %s2903_s7 = inlined_call_operand.vmem [shape: f32[4,16], index: 7, kind: input, shape index: {}]   ;;  %s2904_s8 = inlined_call_operand.vmem [shape: f32[1,16], index: 8, kind: input, shape index: {}]   ;;  %s2905_s9 = inlined_call_operand.vmem [shape: f32[16,4], index: 9, kind: input, shape index: {}]   ;;  %s2906_s10 = inlined_call_operand.vmem [shape: f32[1,4], index: 10, kind: input, shape index: {}]   ;;  %s2907_s11 = inlined_call_operand.vmem [shape: f32[1,4], index: 11, kind: input, shape index: {}]   ;;  %s2908_s12 = inlined_call_operand.vmem [shape: f32[1,4], index: 12, kind: input, shape index: {}]   ;;  %s2909_s13 = inlined_call_operand.vmem [shape: f32[4,16], index: 13, kind: input, shape index: {}]   ;;  %s2910_s14 = inlined_call_operand.vmem [shape: f32[1,16], index: 14, kind: input, shape index: {}]   ;;  %s2911_s15 = inlined_call_operand.hbm [shape: f32[2,1,16], index: 15, kind: output, shape index: {0}]   ;;  %s2912_s16 = inlined_call_operand.hbm [shape: f32[2,1,16], index: 16, kind: output, shape index: {1}]  }
   0x1   :  { %2915 = sst [smem:[#allocation10_spill]] %s2896_s0  ;;  %v22_v0 = vstv %s2898_s2 }
   0x2   :  { %2916 = sst [smem:[#allocation11_spill]] %s2897_s1  ;;  %23 = vst [vmem:[#allocation2] sm:$0x1] %v22_v0 }
   0x3   :  { %2917 = sst [smem:[#allocation12_spill]] %s2899_s3 }
   0x4   :  { %2918 = sst [smem:[#allocation13_spill]] %s2900_s4 }
   0x5   :  { %2919 = sst [smem:[#allocation14_spill]] %s2901_s5 }
   0x6   :  { %2920 = sst [smem:[#allocation15_spill]] %s2902_s6 }
   0x7   :  { %2921 = sst [smem:[#allocation16_spill]] %s2903_s7 }
   0x8   :  { %24 = vsyncpa [#allocation4], 0 }
   0x9   :  { %26 = vsyncpa [#allocation4 + $0x1], 0 }
   0xa   :  { %27 = vsyncpa [#allocation6], 0 }
   0xb   :  { %29 = vsyncpa [#allocation6 + $0x1], 0  ;;  %s2117_s23 = smov 0   ;;  %s2119_s24 = smov 0  }
   0xc   :  { %s2121_s25 = smov 0   ;;  %s2123_s26 = smov 0  }
   0xd LB: > { %s2138_s2 = sadd.s32 4294967295, %s2022_s26   ;;  %s1728_s27 = sadd.s32 4294967294, %s2022_s26   ;;  %s2022_s26 = sphi %s2123_s26, %s2938_s26   ;;  %s2018_s25 = sphi %s2121_s25, %s2937_s25   ;;  %s2014_s24 = sphi %s2119_s24, %s2936_s24   ;;  %s2010_s23 = sphi %s2117_s23, %s2935_s23  }
   0xe   : > { %s2142_s28 = sadd.s32 1, %s2022_s26   ;;  %s362_s29 = sadd.s32 1, %s2018_s25 }
   0xf   : > { %s359_s30 = ssub.s32 %s2022_s26, %s2142_s28  ;;  %p372_p0 = scmp.ne.s32.totalorder %s2018_s25, %s2014_s24 }
  0x10   : > { %p360_p1 = scmp.eq.s32.totalorder %s359_s30, 0  ;;  %p373_p2 = scmp.eq.s32.totalorder %s2138_s2, 1 }
  0x11   : > { %p378_p3 = scmp.ne.s32.totalorder %s2014_s24, %s2010_s23  ;;  %p379_p4 = scmp.eq.s32.totalorder %s1728_s27, 1 }
  0x12   : > { %s2153_s0 = scalar_select %p360_p1, %s2018_s25, %s362_s29  }
  0x13   : > { %p2155_p5 = por %p373_p2, %p372_p0  ;;  %p2159_p6 = por %p379_p4, %p378_p3 }
  0x14   : > { %2922 = sst [smem:[#allocation9_spill]] %s2153_s0  ;;  %p1731_p7 = scmp.ge.s32.totalorder %s2022_s26, 1 }
  0x15   : > { %p473_p8 = scmp.lt.s32.totalorder %s2022_s26, 3 }
  0x17   : > { %p474_p9 = pnand %p1731_p7, %p473_p8 }
  0x18   : > { %p526_p10 = scmp.lt.s32.totalorder (!%p474_p9), %s2138_s2, 1  ;;  %s2925_s1 = sld [smem:[#allocation11_spill]] (!%p474_p9) }
  0x19   : > { %477 = sbr.rel (%p474_p9) target bundleno = 1804 (0x70c), region = 80  ;;  %s2926_s30 = sld [smem:[#allocation10_spill]] (!%p474_p9) }
  0x1a   : > { %s2927_s3 = sld [smem:[#allocation12_spill]] (!%p474_p9)  ;;  %s2914_s29 = sshll.u32 (!%p474_p9), %s2138_s2, 4 }
  0x1b   : > { %s2928_s4 = sld [smem:[#allocation13_spill]] (!%p474_p9)  ;;  %s2027_s22 = smov (!%p474_p9), [#allocation3]  }
  0x1c   : > { %s2929_s7 = sld [smem:[#allocation16_spill]] (!%p474_p9) }
  0x1d   : > { %s2930_s5 = sld [smem:[#allocation14_spill]] (!%p474_p9) }
  0x1e   : > { %s527_s19 = scalar_select %p526_p10, %s2138_s2, 1  ;;  %v2170_v1 = vld [vmem:[%s2925_s1] ss:$0 sm:$0xff]  ;;  %vm602_vm0 = vcmask 130048   ;;  %vm738_vm1 = vcmask 7168   ;;  %vm2026_vm2 = vmmov 0  }
  0x1f   : > { %vm1343_vm3 = vcmask 24576   ;;  %vm1369_vm4 = vcmask 1043456   ;;  %s2931_s6 = sld [smem:[#allocation15_spill]]  ;;  %vm1365_vm5 = vcmask 31744   ;;  %vm1443_vm6 = vcmask 122880   ;;  %s1630_s1 = scalar_lea.hbm %s2911_s15, %s2914_s29 }
  0x20   : > { %s1746_s20 = sshll.u32 %s527_s19, 8  ;;  %s2804_s19 = sand.u32 1, %s2014_s24  }
  0x21   : > { %s2175_s0 = scalar_lea.vmem %s2926_s30, %s1746_s20  ;;  %s2913_s27 = scalar_lea.vmem [#allocation3], %s2804_s19 }
  0x22   : > { %v533_v2 = vld [vmem:[%s2175_s0 + $0x10] sm:$0xff]  ;;  %v531_v3 = vld [vmem:[%s2175_s0] sm:$0xff]  ;;  %v534_v4 = vld [vmem:[%s2175_s0 + $0x18] sm:$0xff]  ;;  %s1616_s20 = scalar_lea.sflag [#allocation4], %s2804_s19 }
  0x23   : > { %v572_v5 = vmul.f32 %v2170_v1, %v533_v2  ;;  %v570_v6 = vmul.f32 %v2170_v1, %v531_v3  ;;  %v573_v7 = vmul.f32 %v2170_v1, %v534_v4  ;;  %v532_v8 = vld [vmem:[%s2175_s0 + $0x8] sm:$0xff]  ;;  %v535_v11 = vld [vmem:[%s2175_s0 + $0x20] sm:$0xff]  ;;  %v538_v18 = vld [vmem:[%s2175_s0 + $0x38] sm:$0xff] }
  0x24   : > { %v571_v9 = vmul.f32 %v2170_v1, %v532_v8  ;;  %v536_v10 = vld [vmem:[%s2175_s0 + $0x28] sm:$0xff]  ;;  %v574_v17 = vmul.f32 %v2170_v1, %v535_v11  ;;  %v537_v19 = vld [vmem:[%s2175_s0 + $0x30] sm:$0xff]  ;;  %v577_v22 = vmul.f32 %v2170_v1, %v538_v18  ;;  %v539_v25 = vld [vmem:[%s2175_s0 + $0x40] sm:$0xff] }
  0x25   : > { %v609_v12 = vsel %vm602_vm0, %v572_v5, 0.0  ;;  %v603_v13 = vsel %vm602_vm0, %v570_v6, 0.0  ;;  %v612_v14 = vsel %vm602_vm0, %v573_v7, 0.0  ;;  %v575_v16 = vmul.f32 %v2170_v1, %v536_v10  ;;  %v540_v24 = vld [vmem:[%s2175_s0 + $0x48] sm:$0xff]  ;;  %v542_v30 = vld [vmem:[%s2175_s0 + $0x58] sm:$0xff]  ;;  %v541_v31 = vld [vmem:[%s2175_s0 + $0x50] sm:$0xff] }
  0x26   : > { %610 = vadd.xlane.f32.xlu1 %v609_v12  ;;  %604 = vadd.xlane.f32.xlu0 %v603_v13  ;;  %v606_v15 = vsel %vm602_vm0, %v571_v9, 0.0  ;;  %v615_v21 = vsel %vm602_vm0, %v574_v17, 0.0  ;;  %v576_v23 = vmul.f32 %v2170_v1, %v537_v19  ;;  %v624_v26 = vsel %vm602_vm0, %v577_v22, 0.0  ;;  %v544_v36 = vld [vmem:[%s2175_s0 + $0x68] sm:$0xff]  ;;  %v543_v37 = vld [vmem:[%s2175_s0 + $0x60] sm:$0xff]  ;;  %v546_v42 = vld [vmem:[%s2175_s0 + $0x78] sm:$0xff] }
  0x27   : > { %v618_v20 = vsel %vm602_vm0, %v575_v16, 0.0  ;;  %v579_v28 = vmul.f32 %v2170_v1, %v540_v24  ;;  %v578_v29 = vmul.f32 %v2170_v1, %v539_v25  ;;  %v581_v34 = vmul.f32 %v2170_v1, %v542_v30  ;;  %v545_v43 = vld [vmem:[%s2175_s0 + $0x70] sm:$0xff]  ;;  %v548_v48 = vld [vmem:[%s2175_s0 + $0x88] sm:$0xff]  ;;  %v547_v49 = vld [vmem:[%s2175_s0 + $0x80] sm:$0xff] }
  0x28   : > { %v621_v27 = vsel %vm602_vm0, %v576_v23, 0.0  ;;  %v580_v35 = vmul.f32 %v2170_v1, %v541_v31  ;;  %v583_v40 = vmul.f32 %v2170_v1, %v544_v36  ;;  %v582_v41 = vmul.f32 %v2170_v1, %v543_v37  ;;  %v550_v54 = vld [vmem:[%s2175_s0 + $0x98] sm:$0xff]  ;;  %v549_v55 = vld [vmem:[%s2175_s0 + $0x90] sm:$0xff]  ;;  %v552_v60 = vld [vmem:[%s2175_s0 + $0xa8] sm:$0xff] }
  0x29   : > { %v630_v32 = vsel %vm602_vm0, %v579_v28, 0.0  ;;  %v627_v33 = vsel %vm602_vm0, %v578_v29, 0.0  ;;  %v636_v38 = vsel %vm602_vm0, %v581_v34, 0.0  ;;  %v585_v46 = vmul.f32 %v2170_v1, %v546_v42  ;;  %v551_v61 = vld [vmem:[%s2175_s0 + $0xa0] sm:$0xff]  ;;  %v554_v3 = vld [vmem:[%s2175_s0 + $0xb8] sm:$0xff]  ;;  %v553_v4 = vld [vmem:[%s2175_s0 + $0xb0] sm:$0xff] }
  0x2a   : > { %613 = vadd.xlane.f32.xlu1 %v612_v14  ;;  %607 = vadd.xlane.f32.xlu0 %v606_v15  ;;  %v633_v39 = vsel %vm602_vm0, %v580_v35, 0.0  ;;  %v642_v44 = vsel %vm602_vm0, %v583_v40, 0.0  ;;  %v639_v45 = vsel %vm602_vm0, %v582_v41, 0.0  ;;  %v584_v47 = vmul.f32 %v2170_v1, %v545_v43  ;;  %v556_v9 = vld [vmem:[%s2175_s0 + $0xc8] sm:$0xff]  ;;  %v555_v10 = vld [vmem:[%s2175_s0 + $0xc0] sm:$0xff]  ;;  %v558_v15 = vld [vmem:[%s2175_s0 + $0xd8] sm:$0xff] }
  0x2b   : > { %v648_v50 = vsel %vm602_vm0, %v585_v46, 0.0  ;;  %v587_v52 = vmul.f32 %v2170_v1, %v548_v48  ;;  %v586_v53 = vmul.f32 %v2170_v1, %v547_v49  ;;  %v589_v58 = vmul.f32 %v2170_v1, %v550_v54  ;;  %v557_v16 = vld [vmem:[%s2175_s0 + $0xd0] sm:$0xff]  ;;  %v559_v22 = vld [vmem:[%s2175_s0 + $0xe0] sm:$0xff] }
  0x2c   : > { %v645_v51 = vsel %vm602_vm0, %v584_v47, 0.0  ;;  %v588_v59 = vmul.f32 %v2170_v1, %v549_v55  ;;  %v591_v0 = vmul.f32 %v2170_v1, %v552_v60  ;;  %v590_v2 = vmul.f32 %v2170_v1, %v551_v61  ;;  %v561_v28 = vld [vmem:[%s2175_s0 + $0xf0] sm:$0xff] }
  0x2d   : > { %v654_v56 = vsel %vm602_vm0, %v587_v52, 0.0  ;;  %v651_v57 = vsel %vm602_vm0, %v586_v53, 0.0  ;;  %v660_v62 = vsel %vm602_vm0, %v589_v58, 0.0  ;;  %v593_v7 = vmul.f32 %v2170_v1, %v554_v3  ;;  %v2273_v52 = vld [vmem:[#allocation2] ss:$0 sm:$0xff] }
  0x2e   : > { %619 = vadd.xlane.f32.xlu1 %v618_v20  ;;  %616 = vadd.xlane.f32.xlu0 %v615_v21  ;;  %v657_v63 = vsel %vm602_vm0, %v588_v59, 0.0  ;;  %v666_v5 = vsel %vm602_vm0, %v591_v0, 0.0  ;;  %v663_v6 = vsel %vm602_vm0, %v590_v2, 0.0  ;;  %v592_v8 = vmul.f32 %v2170_v1, %v553_v4  ;;  %v560_v21 = vld [vmem:[%s2175_s0 + $0xe8] sm:$0xff] }
  0x2f   : > { %v672_v11 = vsel %vm602_vm0, %v593_v7, 0.0  ;;  %v595_v13 = vmul.f32 %v2170_v1, %v556_v9  ;;  %v594_v14 = vmul.f32 %v2170_v1, %v555_v10  ;;  %v597_v19 = vmul.f32 %v2170_v1, %v558_v15 }
  0x30   : > { %v669_v12 = vsel %vm602_vm0, %v592_v8, 0.0  ;;  %v596_v20 = vmul.f32 %v2170_v1, %v557_v16  ;;  %v599_v25 = vmul.f32 %v2170_v1, %v560_v21 }
  0x31   : > { %v678_v17 = vsel %vm602_vm0, %v595_v13, 0.0  ;;  %v675_v18 = vsel %vm602_vm0, %v594_v14, 0.0  ;;  %v684_v23 = vsel %vm602_vm0, %v597_v19, 0.0 }
  0x32   : > { %625 = vadd.xlane.f32.xlu1 %v624_v26  ;;  %622 = vadd.xlane.f32.xlu0 %v621_v27  ;;  %v681_v24 = vsel %vm602_vm0, %v596_v20, 0.0  ;;  %v598_v26 = vmul.f32 %v2170_v1, %v559_v22  ;;  %v562_v27 = vld [vmem:[%s2175_s0 + $0xf8] sm:$0xff]  ;;  %v690_v29 = vsel %vm602_vm0, %v599_v25, 0.0 }
  0x33   : > { %v601_v31 = vmul.f32 %v2170_v1, %v562_v27 }
  0x34   : > { %v687_v30 = vsel %vm602_vm0, %v598_v26, 0.0 }
  0x36   : > { %631 = vadd.xlane.f32.xlu1 %v630_v32  ;;  %628 = vadd.xlane.f32.xlu0 %v627_v33  ;;  %v600_v32 = vmul.f32 %v2170_v1, %v561_v28  ;;  %v696_v33 = vsel %vm602_vm0, %v601_v31, 0.0 }
  0x38   : > { %v693_v34 = vsel %vm602_vm0, %v600_v32, 0.0 }
  0x3a   : > { %637 = vadd.xlane.f32.xlu1 %v636_v38  ;;  %634 = vadd.xlane.f32.xlu0 %v633_v39 }
  0x3e   : > { %643 = vadd.xlane.f32.xlu1 %v642_v44  ;;  %640 = vadd.xlane.f32.xlu0 %v639_v45 }
  0x42   : > { %649 = vadd.xlane.f32.xlu1 %v648_v50  ;;  %646 = vadd.xlane.f32.xlu0 %v645_v51 }
  0x46   : > { %655 = vadd.xlane.f32.xlu1 %v654_v56  ;;  %652 = vadd.xlane.f32.xlu0 %v651_v57 }
  0x4a   : > { %661 = vadd.xlane.f32.xlu1 %v660_v62  ;;  %658 = vadd.xlane.f32.xlu0 %v657_v63 }
  0x4e   : > { %667 = vadd.xlane.f32.xlu1 %v666_v5  ;;  %664 = vadd.xlane.f32.xlu0 %v663_v6 }
  0x52   : > { %673 = vadd.xlane.f32.xlu1 %v672_v11  ;;  %670 = vadd.xlane.f32.xlu0 %v669_v12 }
  0x56   : > { %679 = vadd.xlane.f32.xlu1 %v678_v17  ;;  %676 = vadd.xlane.f32.xlu0 %v675_v18 }
  0x5a   : > { %685 = vadd.xlane.f32.xlu1 %v684_v23  ;;  %682 = vadd.xlane.f32.xlu0 %v681_v24 }
  0x5e   : > { %691 = vadd.xlane.f32.xlu1 %v690_v29  ;;  %688 = vadd.xlane.f32.xlu0 %v687_v30 }
  0x62   : > { %697 = vadd.xlane.f32.xlu1 %v696_v33  ;;  %694 = vadd.xlane.f32.xlu0 %v693_v34 }
  0xaf   : > { %v611_v35 = vpop.xlane.xlu1 %610  ;;  %v605_v36 = vpop.xlane.xlu0 %604 }
  0xb0   : > { %v2276_v55 = vadd.f32 %v2273_v52, %v605_v36  ;;  %v2300_v2 = vadd.f32 %v2273_v52, %v611_v35 }
  0xb2   : > { %v739_v3 = vsel %vm738_vm1, %v2276_v55, -inf  ;;  %v741_v19 = vsel %vm738_vm1, %v2300_v2, -inf }
  0xb3   : > { %v614_v37 = vpop.xlane.xlu1 %613  ;;  %v608_v38 = vpop.xlane.xlu0 %607 }
  0xb4   : > { %v2285_v58 = vadd.f32 %v2273_v52, %v608_v38  ;;  %v2305_v4 = vadd.f32 %v2273_v52, %v614_v37 }
  0xb6   : > { %v740_v9 = vsel %vm738_vm1, %v2285_v58, -inf  ;;  %v742_v20 = vsel %vm738_vm1, %v2305_v4, -inf }
  0xb7   : > { %v620_v39 = vpop.xlane.xlu1 %619  ;;  %v617_v40 = vpop.xlane.xlu0 %616 }
  0xb8   : > { %v2279_v56 = vadd.f32 %v2273_v52, %v620_v39  ;;  %v2282_v57 = vadd.f32 %v2273_v52, %v617_v40 }
  0xba   : > { %v745_v5 = vsel %vm738_vm1, %v2279_v56, -inf  ;;  %v743_v6 = vsel %vm738_vm1, %v2282_v57, -inf }
  0xbb   : > { %v626_v41 = vpop.xlane.xlu1 %625  ;;  %v623_v42 = vpop.xlane.xlu0 %622  ;;  %v746_v21 = vmax.f32 %v740_v9, %v745_v5  ;;  %v744_v22 = vmax.f32 %v739_v3, %v743_v6 }
  0xbc   : > { %v2288_v59 = vadd.f32 %v2273_v52, %v626_v41  ;;  %v2291_v60 = vadd.f32 %v2273_v52, %v623_v42 }
  0xbe   : > { %v749_v10 = vsel %vm738_vm1, %v2288_v59, -inf  ;;  %v747_v11 = vsel %vm738_vm1, %v2291_v60, -inf }
  0xbf   : > { %v632_v43 = vpop.xlane.xlu1 %631  ;;  %v629_v44 = vpop.xlane.xlu0 %628  ;;  %v750_v23 = vmax.f32 %v742_v20, %v749_v10  ;;  %v748_v27 = vmax.f32 %v741_v19, %v747_v11  ;;  %v2024_v11 = vmov 0  }
  0xc0   : > { %v2294_v63 = vadd.f32 %v2273_v52, %v632_v43  ;;  %v2297_v0 = vadd.f32 %v2273_v52, %v629_v44  ;;  %1829 = vset.pattern.permute.xlu1 %v2024_v11  ;;  %1828 = vset.pattern.permute.xlu0 %v2024_v11 }
  0xc2   : > { %v753_v15 = vsel %vm738_vm1, %v2294_v63, -inf  ;;  %v751_v16 = vsel %vm738_vm1, %v2297_v0, -inf }
  0xc3   : > { %v638_v45 = vpop.xlane.xlu1 %637  ;;  %v635_v1 = vpop.xlane.xlu0 %634  ;;  %v754_v28 = vmax.f32 %v746_v21, %v753_v15  ;;  %v752_v29 = vmax.f32 %v744_v22, %v751_v16 }
  0xc4   : > { %v2312_v7 = vadd.f32 %v2273_v52, %v638_v45  ;;  %v2315_v8 = vadd.f32 %v2273_v52, %v635_v1 }
  0xc6   : > { %v757_v24 = vsel %vm738_vm1, %v2312_v7, -inf  ;;  %v755_v25 = vsel %vm738_vm1, %v2315_v8, -inf }
  0xc7   : > { %v644_v46 = vpop.xlane.xlu1 %643  ;;  %v641_v47 = vpop.xlane.xlu0 %640  ;;  %v758_v37 = vmax.f32 %v750_v23, %v757_v24  ;;  %v756_v38 = vmax.f32 %v748_v27, %v755_v25 }
  0xc8   : > { %v2324_v12 = vadd.f32 %v2273_v52, %v644_v46  ;;  %v2331_v17 = vadd.f32 %v2273_v52, %v641_v47 }
  0xca   : > { %v761_v30 = vsel %vm738_vm1, %v2324_v12, -inf  ;;  %v759_v33 = vsel %vm738_vm1, %v2331_v17, -inf }
  0xcb   : > { %v650_v48 = vpop.xlane.xlu1 %649  ;;  %v647_v49 = vpop.xlane.xlu0 %646  ;;  %v762_v41 = vmax.f32 %v754_v28, %v761_v30  ;;  %v760_v45 = vmax.f32 %v752_v29, %v759_v33 }
  0xcc   : > { %v2334_v18 = vadd.f32 %v2273_v52, %v650_v48  ;;  %v2345_v26 = vadd.f32 %v2273_v52, %v647_v49 }
  0xce   : > { %v765_v34 = vsel %vm738_vm1, %v2334_v18, -inf  ;;  %v763_v42 = vsel %vm738_vm1, %v2345_v26, -inf }
  0xcf   : > { %v656_v50 = vpop.xlane.xlu1 %655  ;;  %v653_v51 = vpop.xlane.xlu0 %652  ;;  %v766_v1 = vmax.f32 %v758_v37, %v765_v34 }
  0xd0   : > { %v2354_v35 = vadd.f32 %v2273_v52, %v656_v50  ;;  %v2357_v36 = vadd.f32 %v2273_v52, %v653_v51 }
  0xd2   : > { %v769_v50 = vsel %vm738_vm1, %v2354_v35, -inf  ;;  %v767_v51 = vsel %vm738_vm1, %v2357_v36, -inf }
  0xd3   : > { %v662_v53 = vpop.xlane.xlu1 %661  ;;  %v659_v54 = vpop.xlane.xlu0 %658 }
  0xd4   : > { %v2360_v39 = vadd.f32 %v2273_v52, %v662_v53  ;;  %v2363_v40 = vadd.f32 %v2273_v52, %v659_v54 }
  0xd6   : > { %v771_v3 = vsel %vm738_vm1, %v2363_v40, -inf }
  0xd7   : > { %v668_v61 = vpop.xlane.xlu1 %667  ;;  %v665_v62 = vpop.xlane.xlu0 %664 }
  0xd8   : > { %v2368_v43 = vadd.f32 %v2273_v52, %v668_v61  ;;  %v2371_v44 = vadd.f32 %v2273_v52, %v665_v62  ;;  %v764_v61 = vmax.f32 %v756_v38, %v763_v42  ;;  %v773_v62 = vsel %vm738_vm1, %v2360_v39, -inf }
  0xd9   : > { %v774_v25 = vmax.f32 %v766_v1, %v773_v62 }
  0xda   : > { %v777_v5 = vsel %vm738_vm1, %v2368_v43, -inf  ;;  %v775_v6 = vsel %vm738_vm1, %v2371_v44, -inf  ;;  %v772_v27 = vmax.f32 %v764_v61, %v771_v3 }
  0xdb   : > { %v674_v13 = vpop.xlane.xlu1 %673  ;;  %v671_v14 = vpop.xlane.xlu0 %670 }
  0xdc   : > { %v2374_v46 = vadd.f32 %v2273_v52, %v674_v13  ;;  %v2377_v47 = vadd.f32 %v2273_v52, %v671_v14  ;;  %v770_v13 = vmax.f32 %v762_v41, %v769_v50  ;;  %v768_v14 = vmax.f32 %v760_v45, %v767_v51 }
  0xde   : > { %v781_v15 = vsel %vm738_vm1, %v2374_v46, -inf  ;;  %v779_v16 = vsel %vm738_vm1, %v2377_v47, -inf  ;;  %v778_v28 = vmax.f32 %v770_v13, %v777_v5  ;;  %v776_v29 = vmax.f32 %v768_v14, %v775_v6 }
  0xdf   : > { %v680_v31 = vpop.xlane.xlu1 %679  ;;  %v677_v32 = vpop.xlane.xlu0 %676  ;;  %v782_v34 = vmax.f32 %v774_v25, %v781_v15  ;;  %v780_v37 = vmax.f32 %v772_v27, %v779_v16 }
  0xe0   : > { %v2384_v53 = vadd.f32 %v2273_v52, %v680_v31  ;;  %v2387_v54 = vadd.f32 %v2273_v52, %v677_v32 }
  0xe2   : > { %v785_v21 = vsel %vm738_vm1, %v2384_v53, -inf  ;;  %v783_v22 = vsel %vm738_vm1, %v2387_v54, -inf }
  0xe3   : > { %v686_v48 = vpop.xlane.xlu1 %685  ;;  %v683_v49 = vpop.xlane.xlu0 %682  ;;  %v786_v38 = vmax.f32 %v778_v28, %v785_v21  ;;  %v784_v41 = vmax.f32 %v776_v29, %v783_v22 }
  0xe4   : > { %v2398_v9 = vadd.f32 %v2273_v52, %v686_v48  ;;  %v2401_v10 = vadd.f32 %v2273_v52, %v683_v49 }
  0xe6   : > { %v789_v30 = vsel %vm738_vm1, %v2398_v9, -inf  ;;  %v787_v31 = vsel %vm738_vm1, %v2401_v10, -inf }
  0xe7   : > { %v692_v19 = vpop.xlane.xlu1 %691  ;;  %v689_v20 = vpop.xlane.xlu0 %688  ;;  %v790_v49 = vmax.f32 %v782_v34, %v789_v30  ;;  %v788_v50 = vmax.f32 %v780_v37, %v787_v31 }
  0xe8   : > { %v2412_v23 = vadd.f32 %v2273_v52, %v692_v19  ;;  %v2415_v24 = vadd.f32 %v2273_v52, %v689_v20 }
  0xea   : > { %v793_v32 = vsel %vm738_vm1, %v2412_v23, -inf  ;;  %v791_v33 = vsel %vm738_vm1, %v2415_v24, -inf }
  0xeb   : > { %v698_v42 = vpop.xlane.xlu1 %697  ;;  %v695_v45 = vpop.xlane.xlu0 %694  ;;  %v794_v51 = vmax.f32 %v786_v38, %v793_v32  ;;  %v792_v61 = vmax.f32 %v784_v41, %v791_v33 }
  0xec   : > { %v2426_v1 = vadd.f32 %v2273_v52, %v698_v42  ;;  %v2429_v48 = vadd.f32 %v2273_v52, %v695_v45 }
  0xed   : > { %v799_v11 = vmax.f32 %v792_v61, %v794_v51 }
  0xee   : > { %v797_v62 = vsel %vm738_vm1, %v2426_v1, -inf  ;;  %v795_v3 = vsel %vm738_vm1, %v2429_v48, -inf }
  0xef   : > { %v798_v5 = vmax.f32 %v790_v49, %v797_v62  ;;  %v796_v6 = vmax.f32 %v788_v50, %v795_v3 }
  0xf1   : > { %v800_v13 = vmax.f32 %v796_v6, %v798_v5 }
  0xf3   : > { %v801_v14 = vmax.f32 %v799_v11, %v800_v13 }
  0xf5   : > { %v802_v15 = vrot.slane %v801_v14, 4 }
  0xf7   : > { %v803_v16 = vmax.f32 %v801_v14, %v802_v15 }
  0xf9   : > { %v804_v19 = vrot.slane %v803_v16, 2 }
  0xfb   : > { %v805_v52 = vmax.f32 %v803_v16, %v804_v19 }
  0xfd   : > { %v806_v20 = vrot.slane %v805_v52, 1 }
  0xff   : > { %v2435_v21 = vmax.f32 %v805_v52, %v806_v20 }
 0x101   : > { %v808_v22 = vsub.f32 %v2276_v55, %v2435_v21  ;;  %v809_v25 = vsub.f32 %v2285_v58, %v2435_v21  ;;  %v810_v27 = vsub.f32 %v2300_v2, %v2435_v21  ;;  %v811_v28 = vsub.f32 %v2305_v4, %v2435_v21 }
 0x102   : > { %v812_v29 = vsub.f32 %v2282_v57, %v2435_v21  ;;  %v813_v33 = vsub.f32 %v2279_v56, %v2435_v21  ;;  %v814_v55 = vsub.f32 %v2291_v60, %v2435_v21  ;;  %v815_v2 = vsub.f32 %v2288_v59, %v2435_v21 }
 0x103   : > { %v840_v30 = vmul.f32 1.442695, %v808_v22  ;;  %v842_v31 = vmul.f32 1.442695, %v809_v25  ;;  %v844_v32 = vmul.f32 1.442695, %v810_v27  ;;  %v816_v57 = vsub.f32 %v2297_v0, %v2435_v21 }
 0x104   : > { %v846_v34 = vmul.f32 1.442695, %v811_v28  ;;  %v848_v58 = vmul.f32 1.442695, %v812_v29  ;;  %v850_v4 = vmul.f32 1.442695, %v813_v33  ;;  %v817_v56 = vsub.f32 %v2294_v63, %v2435_v21 }
 0x105   : > { %1830 = vpow2.f32 %v840_v30  ;;  %v852_v37 = vmul.f32 1.442695, %v814_v55  ;;  %v854_v38 = vmul.f32 1.442695, %v815_v2  ;;  %v818_v60 = vsub.f32 %v2315_v8, %v2435_v21 }
 0x106   : > { %1832 = vpow2.f32 %v842_v31  ;;  %v856_v41 = vmul.f32 1.442695, %v816_v57  ;;  %v819_v59 = vsub.f32 %v2312_v7, %v2435_v21  ;;  %v858_v42 = vmul.f32 1.442695, %v817_v56 }
 0x107   : > { %1834 = vpow2.f32 %v844_v32  ;;  %v820_v0 = vsub.f32 %v2331_v17, %v2435_v21  ;;  %v860_v49 = vmul.f32 1.442695, %v818_v60  ;;  %v821_v51 = vsub.f32 %v2324_v12, %v2435_v21 }
 0x108   : > { %1836 = vpow2.f32 %v846_v34  ;;  %v862_v7 = vmul.f32 1.442695, %v819_v59  ;;  %v822_v3 = vsub.f32 %v2345_v26, %v2435_v21  ;;  %v823_v12 = vsub.f32 %v2334_v18, %v2435_v21 }
 0x109   : > { %1838 = vpow2.f32 %v848_v58  ;;  %v864_v5 = vmul.f32 1.442695, %v820_v0  ;;  %v866_v14 = vmul.f32 1.442695, %v821_v51  ;;  %v824_v26 = vsub.f32 %v2357_v36, %v2435_v21 }
 0x10a   : > { %1840 = vpow2.f32 %v850_v4  ;;  %v868_v52 = vmul.f32 1.442695, %v822_v3  ;;  %v825_v18 = vsub.f32 %v2354_v35, %v2435_v21  ;;  %v870_v27 = vmul.f32 1.442695, %v823_v12 }
 0x10b   : > { %1842 = vpow2.f32 %v852_v37  ;;  %v826_v36 = vsub.f32 %v2363_v40, %v2435_v21  ;;  %v872_v31 = vmul.f32 1.442695, %v824_v26  ;;  %v827_v35 = vsub.f32 %v2360_v39, %v2435_v21 }
 0x10c   : > { %1844 = vpow2.f32 %v854_v38  ;;  %v874_v55 = vmul.f32 1.442695, %v825_v18  ;;  %v828_v40 = vsub.f32 %v2371_v44, %v2435_v21  ;;  %v829_v39 = vsub.f32 %v2368_v43, %v2435_v21 }
 0x10d   : > { %1846 = vpow2.f32 %v856_v41  ;;  %v876_v57 = vmul.f32 1.442695, %v826_v36  ;;  %v878_v60 = vmul.f32 1.442695, %v827_v35  ;;  %v830_v44 = vsub.f32 %v2377_v47, %v2435_v21 }
 0x10e   : > { %1848 = vpow2.f32 %v858_v42  ;;  %v880_v0 = vmul.f32 1.442695, %v828_v40  ;;  %v831_v43 = vsub.f32 %v2374_v46, %v2435_v21  ;;  %v832_v47 = vsub.f32 %v2387_v54, %v2435_v21 }
 0x10f   : > { %1850 = vpow2.f32 %v860_v49  ;;  %v833_v46 = vsub.f32 %v2384_v53, %v2435_v21  ;;  %v834_v54 = vsub.f32 %v2401_v10, %v2435_v21  ;;  %v835_v53 = vsub.f32 %v2398_v9, %v2435_v21 }
 0x110   : > { %1852 = vpow2.f32 %v862_v7  ;;  %v882_v7 = vmul.f32 1.442695, %v829_v39  ;;  %v836_v10 = vsub.f32 %v2415_v24, %v2435_v21  ;;  %v837_v9 = vsub.f32 %v2412_v23, %v2435_v21 }
 0x111   : > { %1854 = vpow2.f32 %v864_v5  ;;  %v884_v5 = vmul.f32 1.442695, %v830_v44  ;;  %v838_v24 = vsub.f32 %v2429_v48, %v2435_v21  ;;  %v839_v23 = vsub.f32 %v2426_v1, %v2435_v21 }
 0x112   : > { %v2461_v45 = vpop.eup %1830  ;;  %1856 = vpow2.f32 %v866_v14  ;;  %v886_v14 = vmul.f32 1.442695, %v831_v43 }
 0x113   : > { %v2465_v63 = vpop.eup %1832  ;;  %v904_v50 = vsel %vm738_vm1, %v2461_v45, 0.0  ;;  %1858 = vpow2.f32 %v868_v52  ;;  %v888_v52 = vmul.f32 1.442695, %v832_v47  ;;  %v900_v48 = vmul.f32 1.442695, %v838_v24 }
 0x114   : > { %v2469_v8 = vpop.eup %1834  ;;  %v905_v61 = vsel %vm738_vm1, %v2465_v63, 0.0  ;;  %1860 = vpow2.f32 %v870_v27  ;;  %v890_v27 = vmul.f32 1.442695, %v833_v46  ;;  %v902_v43 = vmul.f32 1.442695, %v839_v23 }
 0x115   : > { %v2475_v62 = vpop.eup %1836  ;;  %v906_v17 = vadd.f32 %v905_v61, %v904_v50  ;;  %v907_v6 = vsel %vm738_vm1, %v2469_v8, 0.0  ;;  %1862 = vpow2.f32 %v872_v31  ;;  %v892_v31 = vmul.f32 1.442695, %v834_v54 }
 0x116   : > { %v2481_v11 = vpop.eup %1838  ;;  %v909_v15 = vsel %vm738_vm1, %v2475_v62, 0.0  ;;  %1864 = vpow2.f32 %v874_v55  ;;  %v894_v55 = vmul.f32 1.442695, %v835_v53 }
 0x117   : > { %v908_v13 = vadd.f32 %v907_v6, %v906_v17  ;;  %v2487_v16 = vpop.eup %1840  ;;  %v911_v20 = vsel %vm738_vm1, %v2481_v11, 0.0  ;;  %1866 = vpow2.f32 %v876_v57  ;;  %v896_v57 = vmul.f32 1.442695, %v836_v10 }
 0x118   : > { %v2493_v22 = vpop.eup %1842  ;;  %v913_v28 = vsel %vm738_vm1, %v2487_v16, 0.0  ;;  %1868 = vpow2.f32 %v878_v60  ;;  %v898_v60 = vmul.f32 1.442695, %v837_v9 }
 0x119   : > { %v910_v19 = vadd.f32 %v909_v15, %v908_v13  ;;  %v2499_v29 = vpop.eup %1844  ;;  %v915_v32 = vsel %vm738_vm1, %v2493_v22, 0.0  ;;  %1870 = vpow2.f32 %v880_v0 }
 0x11a   : > { %v2505_v33 = vpop.eup %1846  ;;  %v917_v58 = vsel %vm738_vm1, %v2499_v29, 0.0  ;;  %1872 = vpow2.f32 %v882_v7 }
 0x11b   : > { %v912_v25 = vadd.f32 %v911_v20, %v910_v19  ;;  %v2511_v2 = vpop.eup %1848  ;;  %v919_v37 = vsel %vm738_vm1, %v2505_v33, 0.0  ;;  %1874 = vpow2.f32 %v884_v5 }
 0x11c   : > { %v2517_v56 = vpop.eup %1850  ;;  %v921_v41 = vsel %vm738_vm1, %v2511_v2, 0.0  ;;  %1876 = vpow2.f32 %v886_v14 }
 0x11d   : > { %v914_v30 = vadd.f32 %v913_v28, %v912_v25  ;;  %v2523_v59 = vpop.eup %1852  ;;  %v923_v49 = vsel %vm738_vm1, %v2517_v56, 0.0  ;;  %1878 = vpow2.f32 %v888_v52 }
 0x11e   : > { %v2529_v50 = vpop.eup %1854  ;;  %v925_v61 = vsel %vm738_vm1, %v2523_v59, 0.0  ;;  %1880 = vpow2.f32 %v890_v27 }
 0x11f   : > { %v916_v34 = vadd.f32 %v915_v32, %v914_v30  ;;  %v2535_v17 = vpop.eup %1856  ;;  %v927_v6 = vsel %vm738_vm1, %v2529_v50, 0.0  ;;  %1882 = vpow2.f32 %v892_v31 }
 0x120   : > { %v2541_v13 = vpop.eup %1858  ;;  %v929_v15 = vsel %vm738_vm1, %v2535_v17, 0.0  ;;  %1884 = vpow2.f32 %v894_v55 }
 0x121   : > { %v918_v4 = vadd.f32 %v917_v58, %v916_v34  ;;  %v2547_v19 = vpop.eup %1860  ;;  %v931_v20 = vsel %vm738_vm1, %v2541_v13, 0.0  ;;  %1886 = vpow2.f32 %v896_v57 }
 0x122   : > { %v2553_v25 = vpop.eup %1862  ;;  %v933_v28 = vsel %vm738_vm1, %v2547_v19, 0.0  ;;  %1888 = vpow2.f32 %v898_v60 }
 0x123   : > { %v920_v38 = vadd.f32 %v919_v37, %v918_v4  ;;  %v2559_v30 = vpop.eup %1864  ;;  %v935_v32 = vsel %vm738_vm1, %v2553_v25, 0.0  ;;  %1890 = vpow2.f32 %v900_v48 }
 0x124   : > { %v2565_v34 = vpop.eup %1866  ;;  %v937_v58 = vsel %vm738_vm1, %v2559_v30, 0.0  ;;  %1892 = vpow2.f32 %v902_v43 }
 0x125   : > { %v922_v42 = vadd.f32 %v921_v41, %v920_v38  ;;  %v2571_v4 = vpop.eup %1868  ;;  %v939_v37 = vsel %vm738_vm1, %v2565_v34, 0.0 }
 0x126   : > { %v2577_v38 = vpop.eup %1870  ;;  %v941_v41 = vsel %vm738_vm1, %v2571_v4, 0.0 }
 0x127   : > { %v924_v51 = vadd.f32 %v923_v49, %v922_v42  ;;  %v2583_v42 = vpop.eup %1872  ;;  %v943_v0 = vsel %vm738_vm1, %v2577_v38, 0.0 }
 0x128   : > { %v2587_v49 = vpop.eup %1874  ;;  %v945_v1 = vsel %vm738_vm1, %v2583_v42, 0.0 }
 0x129   : > { %v926_v3 = vadd.f32 %v925_v61, %v924_v51  ;;  %v2591_v21 = vpop.eup %1876  ;;  %v947_v61 = vsel %vm738_vm1, %v2587_v49, 0.0 }
 0x12a   : > { %v949_v5 = vsel %vm738_vm1, %v2591_v21, 0.0 }
 0x12b   : > { %v928_v12 = vadd.f32 %v927_v6, %v926_v3  ;;  %v2595_v3 = vpop.eup %1878 }
 0x12c   : > { %v2599_v6 = vpop.eup %1880  ;;  %v951_v46 = vsel %vm738_vm1, %v2595_v3, 0.0 }
 0x12d   : > { %v930_v26 = vadd.f32 %v929_v15, %v928_v12  ;;  %v2603_v14 = vpop.eup %1882 }
 0x12e   : > { %v2607_v54 = vpop.eup %1884 }
 0x12f   : > { %v932_v18 = vadd.f32 %v931_v20, %v930_v26  ;;  %v953_v26 = vsel %vm738_vm1, %v2599_v6, 0.0  ;;  %v955_v20 = vsel %vm738_vm1, %v2603_v14, 0.0  ;;  %v957_v27 = vsel %vm738_vm1, %v2607_v54, 0.0 }
 0x131   : > { %v934_v36 = vadd.f32 %v933_v28, %v932_v18  ;;  %v2611_v18 = vpop.eup %1886 }
 0x132   : > { %v2615_v28 = vpop.eup %1888  ;;  %v959_v10 = vsel %vm738_vm1, %v2611_v18, 0.0 }
 0x133   : > { %v936_v35 = vadd.f32 %v935_v32, %v934_v36  ;;  %v2619_v31 = vpop.eup %1890 }
 0x134   : > { %v2623_v9 = vpop.eup %1892 }
 0x135   : > { %v938_v40 = vadd.f32 %v937_v58, %v936_v35  ;;  %v961_v35 = vsel %vm738_vm1, %v2615_v28, 0.0  ;;  %v963_v58 = vsel %vm738_vm1, %v2619_v31, 0.0  ;;  %v965_v24 = vsel %vm738_vm1, %v2623_v9, 0.0 }
 0x137   : > { %v940_v39 = vadd.f32 %v939_v37, %v938_v40 }
 0x139   : > { %v942_v44 = vadd.f32 %v941_v41, %v940_v39 }
 0x13b   : > { %v944_v51 = vadd.f32 %v943_v0, %v942_v44 }
 0x13d   : > { %v946_v7 = vadd.f32 %v945_v1, %v944_v51 }
 0x13f   : > { %v948_v47 = vadd.f32 %v947_v61, %v946_v7 }
 0x141   : > { %v950_v12 = vadd.f32 %v949_v5, %v948_v47 }
 0x143   : > { %v952_v15 = vadd.f32 %v951_v46, %v950_v12  ;;  %v2025_v12 = vmov 0.0  }
 0x144   : > { %1757 = vmatprep.subr.mxu0 %v2025_v12  ;;  %1761 = vmatprep.mubr.msk.f32.mxu0 %vm2026_vm2, %v2025_v12 }
 0x145   : > { %v954_v52 = vadd.f32 %v953_v26, %v952_v15  ;;  %1764 = vmatprep.subr.mxu1 %v2025_v12  ;;  %1766 = vmatprep.mubr.msk.f32.mxu1 %vm2026_vm2, %v2025_v12 }
 0x147   : > { %v956_v53 = vadd.f32 %v955_v20, %v954_v52  ;;  %v1900_v20 = vld [vmem:[%s2175_s0 + $0x8] sm:$0xff] }
 0x149   : > { %v958_v36 = vadd.f32 %v957_v27, %v956_v53  ;;  %v1901_v53 = vld [vmem:[%s2175_s0] sm:$0xff] }
 0x14b   : > { %v960_v32 = vadd.f32 %v959_v10, %v958_v36  ;;  %v1902_v36 = vld [vmem:[%s2175_s0 + $0x10] sm:$0xff] }
 0x14d   : > { %v962_v55 = vadd.f32 %v961_v35, %v960_v32  ;;  %v1903_v35 = vld [vmem:[%s2175_s0 + $0x18] sm:$0xff] }
 0x14f   : > { %v964_v40 = vadd.f32 %v963_v58, %v962_v55 }
 0x151   : > { %v966_v57 = vadd.f32 %v965_v24, %v964_v40  ;;  %v1904_v24 = vld [vmem:[%s2175_s0 + $0x20] sm:$0xff] }
 0x153   : > { %v967_v37 = vrot.slane %v966_v57, 4 }
 0x155   : > { %v968_v39 = vadd.f32 %v967_v37, %v966_v57 }
 0x157   : > { %v969_v23 = vrot.slane %v968_v39, 2 }
 0x159   : > { %v970_v60 = vadd.f32 %v969_v23, %v968_v39  ;;  %v1905_v23 = vld [vmem:[%s2175_s0 + $0x28] sm:$0xff] }
 0x15b   : > { %v971_v41 = vrot.slane %v970_v60, 1 }
 0x15d   : > { %v972_v44 = vadd.f32 %v971_v41, %v970_v60 }
 0x15f   : > { %1894 = vrcp.f32 %v972_v44 }
 0x16c   : > { %v2629_v48 = vpop.eup %1894 }
 0x16d   : > { %v975_v0 = vmul.f32 %v2629_v48, %v2465_v63  ;;  %v974_v51 = vmul.f32 %v2629_v48, %v2461_v45  ;;  %v976_v43 = vmul.f32 %v2629_v48, %v2469_v8  ;;  %v983_v1 = vmul.f32 %v2629_v48, %v2511_v2 }
 0x16e   : > { %v977_v7 = vmul.f32 %v2629_v48, %v2475_v62  ;;  %v985_v61 = vmul.f32 %v2629_v48, %v2523_v59  ;;  %v978_v45 = vmul.f32 %v2629_v48, %v2481_v11  ;;  %v987_v63 = vmul.f32 %v2629_v48, %v2535_v17 }
 0x16f   : > { %1013 = vperm.xlu1 %1829, %v975_v0   ;;  %1008 = vperm.xlu0 %1828, %v974_v51   ;;  %v979_v8 = vmul.f32 %v2629_v48, %v2487_v16  ;;  %v989_v2 = vmul.f32 %v2629_v48, %v2547_v19  ;;  %v980_v62 = vmul.f32 %v2629_v48, %v2493_v22  ;;  %v1906_v0 = vld [vmem:[%s2175_s0 + $0x30] sm:$0xff] }
 0x170   : > { %v991_v59 = vmul.f32 %v2629_v48, %v2559_v30  ;;  %v981_v11 = vmul.f32 %v2629_v48, %v2499_v29  ;;  %v993_v17 = vmul.f32 %v2629_v48, %v2571_v4  ;;  %v982_v16 = vmul.f32 %v2629_v48, %v2505_v33 }
 0x171   : > { %v995_v19 = vmul.f32 %v2629_v48, %v2583_v42  ;;  %v984_v22 = vmul.f32 %v2629_v48, %v2517_v56  ;;  %v997_v30 = vmul.f32 %v2629_v48, %v2591_v21  ;;  %v986_v29 = vmul.f32 %v2629_v48, %v2529_v50 }
 0x172   : > { %v999_v4 = vmul.f32 %v2629_v48, %v2599_v6  ;;  %v988_v33 = vmul.f32 %v2629_v48, %v2541_v13  ;;  %v1001_v42 = vmul.f32 %v2629_v48, %v2607_v54  ;;  %v990_v56 = vmul.f32 %v2629_v48, %v2553_v25 }
 0x173   : > { %1018 = vperm.xlu1 %1829, %v976_v43   ;;  %1053 = vperm.xlu0 %1828, %v983_v1   ;;  %v1003_v21 = vmul.f32 %v2629_v48, %v2615_v28  ;;  %v992_v50 = vmul.f32 %v2629_v48, %v2565_v34  ;;  %v1005_v47 = vmul.f32 %v2629_v48, %v2623_v9 }
 0x174   : > { %v994_v13 = vmul.f32 %v2629_v48, %v2577_v38  ;;  %v996_v25 = vmul.f32 %v2629_v48, %v2587_v49  ;;  %v998_v5 = vmul.f32 %v2629_v48, %v2595_v3  ;;  %v1000_v34 = vmul.f32 %v2629_v48, %v2603_v14  ;;  %v1268_v49 = vld [vmem:[%s2927_s3 + $0x8] sm:$0xff]  ;;  %v1267_v3 = vld [vmem:[%s2927_s3] sm:$0xff]  ;;  %s2932_s3 = scalar_lea.vmem [#allocation3], %s2804_s19 }
 0x175   : > { %v1002_v6 = vmul.f32 %v2629_v48, %v2611_v18  ;;  %v1004_v38 = vmul.f32 %v2629_v48, %v2619_v31  ;;  %1758 = vmatpush3.msra.mxu0 %v1268_v49 }
 0x176   : > { %1759 = vmatprep.subr.mxu0 %v2025_v12 }
 0x177   : > { %1023 = vperm.xlu1 %1829, %v977_v7   ;;  %1063 = vperm.xlu0 %1828, %v985_v61  }
 0x178   : > { %1760 = vmatpush3.msra.mxu0 %v1267_v3 }
 0x179   : > { %1776 = vmatprep.subr.mxu0 %v2025_v12 }
 0x17b   : > { %1028 = vperm.xlu1 %1829, %v978_v45   ;;  %1073 = vperm.xlu0 %1828, %v987_v63  }
 0x17f   : > { %1033 = vperm.xlu1 %1829, %v979_v8   ;;  %1083 = vperm.xlu0 %1828, %v989_v2   ;;  %v1907_v8 = vld [vmem:[%s2175_s0 + $0x38] sm:$0xff] }
 0x183   : > { %1038 = vperm.xlu1 %1829, %v980_v62   ;;  %1093 = vperm.xlu0 %1828, %v991_v59  }
 0x187   : > { %1043 = vperm.xlu1 %1829, %v981_v11   ;;  %1103 = vperm.xlu0 %1828, %v993_v17  }
 0x18b   : > { %1048 = vperm.xlu1 %1829, %v982_v16   ;;  %1113 = vperm.xlu0 %1828, %v995_v19   ;;  %v1908_v19 = vld [vmem:[%s2175_s0 + $0x48] sm:$0xff] }
 0x18f   : > { %1058 = vperm.xlu1 %1829, %v984_v22   ;;  %1123 = vperm.xlu0 %1828, %v997_v30   ;;  %v1909_v30 = vld [vmem:[%s2175_s0 + $0x40] sm:$0xff] }
 0x193   : > { %1068 = vperm.xlu1 %1829, %v986_v29   ;;  %1133 = vperm.xlu0 %1828, %v999_v4  }
 0x197   : > { %1078 = vperm.xlu1 %1829, %v988_v33   ;;  %1143 = vperm.xlu0 %1828, %v1001_v42  }
 0x19b   : > { %1088 = vperm.xlu1 %1829, %v990_v56   ;;  %1153 = vperm.xlu0 %1828, %v1003_v21  }
 0x19f   : > { %1098 = vperm.xlu1 %1829, %v992_v50   ;;  %1163 = vperm.xlu0 %1828, %v1005_v47   ;;  %v1910_v50 = vld [vmem:[%s2175_s0 + $0x58] sm:$0xff] }
 0x1a3   : > { %1108 = vperm.xlu1 %1829, %v994_v13   ;;  %v1911_v13 = vld [vmem:[%s2175_s0 + $0x50] sm:$0xff] }
 0x1a7   : > { %1118 = vperm.xlu1 %1829, %v996_v25  }
 0x1ab   : > { %1128 = vperm.xlu1 %1829, %v998_v5  }
 0x1af   : > { %1138 = vperm.xlu1 %1829, %v1000_v34  }
 0x1b3   : > { %1148 = vperm.xlu1 %1829, %v1002_v6  }
 0x1b7   : > { %1158 = vperm.xlu1 %1829, %v1004_v38  }
 0x1ea   : > { %v1014_v46 = vpop.permute.xlu1 %1013  ;;  %v1009_v14 = vpop.permute.xlu0 %1008 }
 0x1eb   : > { %v1167_v18 = vmul.f32 %v1900_v20, %v1014_v46  ;;  %v1166_v27 = vmul.f32 %v1901_v53, %v1009_v14  ;;  %v1912_v46 = vld [vmem:[%s2175_s0 + $0x68] sm:$0xff] }
 0x1ed   : > { %v1199_v31 = vsel %vm602_vm0, %v1167_v18, 0.0  ;;  %v1198_v32 = vsel %vm602_vm0, %v1166_v27, 0.0 }
 0x1ee   : > { %v1019_v15 = vpop.permute.xlu1 %1018  ;;  %v1054_v26 = vpop.permute.xlu0 %1053  ;;  %v1200_v37 = vadd.f32 %v1199_v31, %v1198_v32 }
 0x1ef   : > { %v1168_v10 = vmul.f32 %v1902_v36, %v1019_v15  ;;  %v1175_v22 = vmul.f32 %v1908_v19, %v1054_v26  ;;  %v1913_v15 = vld [vmem:[%s2175_s0 + $0x60] sm:$0xff] }
 0x1f1   : > { %v1201_v40 = vsel %vm602_vm0, %v1168_v10, 0.0  ;;  %v1215_v21 = vsel %vm602_vm0, %v1175_v22, 0.0  ;;  %v1915_v10 = vld [vmem:[%s2175_s0 + $0x70] sm:$0xff] }
 0x1f2   : > { %v1024_v54 = vpop.permute.xlu1 %1023  ;;  %v1064_v52 = vpop.permute.xlu0 %1063  ;;  %v1202_v41 = vadd.f32 %v1201_v40, %v1200_v37  ;;  %v1916_v40 = vld [vmem:[%s2175_s0 + $0x88] sm:$0xff] }
 0x1f3   : > { %v1169_v9 = vmul.f32 %v1903_v35, %v1024_v54  ;;  %v1177_v47 = vmul.f32 %v1910_v50, %v1064_v52 }
 0x1f5   : > { %v1203_v39 = vsel %vm602_vm0, %v1169_v9, 0.0  ;;  %v1219_v3 = vsel %vm602_vm0, %v1177_v47, 0.0 }
 0x1f6   : > { %v1029_v28 = vpop.permute.xlu1 %1028  ;;  %v1074_v55 = vpop.permute.xlu0 %1073  ;;  %v1204_v43 = vadd.f32 %v1203_v39, %v1202_v41 }
 0x1f7   : > { %v1170_v57 = vmul.f32 %v1904_v24, %v1029_v28  ;;  %v1179_v14 = vmul.f32 %v1912_v46, %v1074_v55  ;;  %v1914_v28 = vld [vmem:[%s2175_s0 + $0x78] sm:$0xff] }
 0x1f9   : > { %v1205_v48 = vsel %vm602_vm0, %v1170_v57, 0.0  ;;  %v1223_v27 = vsel %vm602_vm0, %v1179_v14, 0.0  ;;  %v1917_v57 = vld [vmem:[%s2175_s0 + $0x80] sm:$0xff] }
 0x1fa   : > { %v1034_v58 = vpop.permute.xlu1 %1033  ;;  %v1084_v1 = vpop.permute.xlu0 %1083  ;;  %v1206_v61 = vadd.f32 %v1205_v48, %v1204_v43  ;;  %v1919_v43 = vld [vmem:[%s2175_s0 + $0x90] sm:$0xff] }
 0x1fb   : > { %v1171_v60 = vmul.f32 %v1905_v23, %v1034_v58  ;;  %v1181_v36 = vmul.f32 %v1914_v28, %v1084_v1 }
 0x1fd   : > { %v1207_v7 = vsel %vm602_vm0, %v1171_v60, 0.0  ;;  %v1227_v58 = vsel %vm602_vm0, %v1181_v36, 0.0 }
 0x1fe   : > { %v1039_v44 = vpop.permute.xlu1 %1038  ;;  %v1208_v62 = vadd.f32 %v1207_v7, %v1206_v61  ;;  %v1094_v17 = vpop.permute.xlu0 %1093 }
 0x1ff   : > { %v1172_v51 = vmul.f32 %v1906_v0, %v1039_v44  ;;  %v1183_v24 = vmul.f32 %v1916_v40, %v1094_v17  ;;  %v1918_v0 = vld [vmem:[%s2175_s0 + $0x98] sm:$0xff] }
 0x201   : > { %v1209_v63 = vsel %vm602_vm0, %v1172_v51, 0.0  ;;  %v1231_v48 = vsel %vm602_vm0, %v1183_v24, 0.0 }
 0x202   : > { %v1044_v45 = vpop.permute.xlu1 %1043  ;;  %v1210_v11 = vadd.f32 %v1209_v63, %v1208_v62  ;;  %v1104_v5 = vpop.permute.xlu0 %1103  ;;  %v1920_v62 = vld [vmem:[%s2175_s0 + $0xa8] sm:$0xff] }
 0x203   : > { %v1173_v2 = vmul.f32 %v1907_v8, %v1044_v45  ;;  %v1185_v51 = vmul.f32 %v1918_v0, %v1104_v5 }
 0x205   : > { %v1211_v59 = vsel %vm602_vm0, %v1173_v2, 0.0  ;;  %v1235_v2 = vsel %vm602_vm0, %v1185_v51, 0.0 }
 0x206   : > { %v1049_v16 = vpop.permute.xlu1 %1048  ;;  %v1212_v4 = vadd.f32 %v1211_v59, %v1210_v11  ;;  %v1114_v20 = vpop.permute.xlu0 %1113  ;;  %v1921_v11 = vld [vmem:[%s2175_s0 + $0xa0] sm:$0xff] }
 0x207   : > { %v1174_v29 = vmul.f32 %v1909_v30, %v1049_v16  ;;  %v1187_v59 = vmul.f32 %v1920_v62, %v1114_v20  ;;  %v1269_v62 = vld [vmem:[%s2928_s4] sm:$0x1]  ;;  %s1632_s4 = sshll.u32 %s2932_s3, 4  ;;  %s1633_s4 = int_to_ptr.vmem [resolvable:$true] %s1632_s4 }
 0x208   : > { %s1932_s21 = scalar_lea.vmem %s1633_s4, 16 }
 0x209   : > { %v1213_v33 = vsel %vm602_vm0, %v1174_v29, 0.0  ;;  %v1239_v29 = vsel %vm602_vm0, %v1187_v59, 0.0  ;;  %p1933_p11 = scmp.ne.s32.totalorder %s1633_s4, %s1932_s21 }
 0x20a   : > { %v1214_v42 = vadd.f32 %v1213_v33, %v1212_v4  ;;  %v1059_v56 = vpop.permute.xlu1 %1058  ;;  %v1124_v39 = vpop.permute.xlu0 %1123  ;;  %v1922_v4 = vld [vmem:[%s2175_s0 + $0xb8] sm:$0xff] }
 0x20b   : > { %v1176_v25 = vmul.f32 %v1911_v13, %v1059_v56  ;;  %v1189_v33 = vmul.f32 %v1922_v4, %v1124_v39  ;;  %p1934_p12 = pnand %p1933_p11, %p2155_p5 }
 0x20c   : > { %v1216_v34 = vadd.f32 %v1215_v21, %v1214_v42  ;;  %v1923_v42 = vld [vmem:[%s2175_s0 + $0xb0] sm:$0xff] }
 0x20d   : > { %v1217_v6 = vsel %vm602_vm0, %v1176_v25, 0.0  ;;  %v1243_v5 = vsel %vm602_vm0, %v1189_v33, 0.0  ;;  %v1363_v33 = vld [vmem:[%s2929_s7] sm:$0xf]  ;;  %p1935_p13 = pneg %p1934_p12 }
 0x20e   : > { %v1218_v38 = vadd.f32 %v1217_v6, %v1216_v34  ;;  %v1069_v49 = vpop.permute.xlu1 %1068  ;;  %v1134_v45 = vpop.permute.xlu0 %1133  ;;  %v1924_v34 = vld [vmem:[%s2175_s0 + $0xc8] sm:$0xff]  ;;  %1765 = vmatpush3.msk.msra.mxu1 %vm1369_vm4, %v1363_v33 }
 0x20f   : > { %v1178_v26 = vmul.f32 %v1913_v15, %v1069_v49  ;;  %v1191_v6 = vmul.f32 %v1924_v34, %v1134_v45  ;;  %1769 = vmatprep.subr.mxu1 %v2025_v12 }
 0x210   : > { %v1220_v54 = vadd.f32 %v1219_v3, %v1218_v38  ;;  %v1925_v38 = vld [vmem:[%s2175_s0 + $0xc0] sm:$0xff] }
 0x211   : > { %v1221_v52 = vsel %vm602_vm0, %v1178_v26, 0.0 }
 0x212   : > { %v1222_v18 = vadd.f32 %v1221_v52, %v1220_v54  ;;  %v1079_v53 = vpop.permute.xlu1 %1078  ;;  %v1144_v21 = vpop.permute.xlu0 %1143  ;;  %v1247_v54 = vsel %vm602_vm0, %v1191_v6, 0.0  ;;  %v1926_v52 = vld [vmem:[%s2175_s0 + $0xd8] sm:$0xff] }
 0x213   : > { %v1180_v31 = vmul.f32 %v1915_v10, %v1079_v53  ;;  %v1193_v20 = vmul.f32 %v1926_v52, %v1144_v21 }
 0x214   : > { %v1224_v32 = vadd.f32 %v1223_v27, %v1222_v18  ;;  %v1927_v18 = vld [vmem:[%s2175_s0 + $0xd0] sm:$0xff] }
 0x215   : > { %v1225_v35 = vsel %vm602_vm0, %v1180_v31, 0.0  ;;  %v1251_v31 = vsel %vm602_vm0, %v1193_v20, 0.0 }
 0x216   : > { %v1226_v9 = vadd.f32 %v1225_v35, %v1224_v32  ;;  %v1089_v55 = vpop.permute.xlu1 %1088  ;;  %v1154_v14 = vpop.permute.xlu0 %1153  ;;  %v1928_v32 = vld [vmem:[%s2175_s0 + $0xe8] sm:$0xff] }
 0x217   : > { %v1182_v37 = vmul.f32 %v1917_v57, %v1089_v55  ;;  %v1195_v35 = vmul.f32 %v1928_v32, %v1154_v14 }
 0x218   : > { %v1228_v23 = vadd.f32 %v1227_v58, %v1226_v9  ;;  %v1929_v9 = vld [vmem:[%s2175_s0 + $0xe0] sm:$0xff] }
 0x219   : > { %v1229_v60 = vsel %vm602_vm0, %v1182_v37, 0.0  ;;  %v1255_v39 = vsel %vm602_vm0, %v1195_v35, 0.0 }
 0x21a   : > { %v1230_v41 = vadd.f32 %v1229_v60, %v1228_v23  ;;  %v1099_v44 = vpop.permute.xlu1 %1098  ;;  %v1164_v58 = vpop.permute.xlu0 %1163  ;;  %v1930_v23 = vld [vmem:[%s2175_s0 + $0xf8] sm:$0xff] }
 0x21b   : > { %v1184_v1 = vmul.f32 %v1919_v43, %v1099_v44  ;;  %v1197_v60 = vmul.f32 %v1930_v23, %v1164_v58 }
 0x21c   : > { %v1232_v7 = vadd.f32 %v1231_v48, %v1230_v41  ;;  %v1931_v41 = vld [vmem:[%s2175_s0 + $0xf0] sm:$0xff]  ;;  %s1936_s0 = sshll.u32 %s2027_s22, 4  ;;  %s1937_s0 = int_to_ptr.vmem [resolvable:$false] %s1936_s0 }
 0x21d   : > { %v1233_v61 = vsel %vm602_vm0, %v1184_v1, 0.0  ;;  %v1259_v43 = vsel %vm602_vm0, %v1197_v60, 0.0  ;;  %p1939_p0 = scmp.lt.s32.totalorder %s1633_s4, %s1937_s0 }
 0x21e   : > { %v1234_v63 = vadd.f32 %v1233_v61, %v1232_v7  ;;  %v1109_v8 = vpop.permute.xlu1 %1108 }
 0x21f   : > { %v1186_v17 = vmul.f32 %v1921_v11, %v1109_v8 }
 0x220   : > { %v1236_v16 = vadd.f32 %v1235_v2, %v1234_v63 }
 0x221   : > { %v1237_v19 = vsel %vm602_vm0, %v1186_v17, 0.0 }
 0x222   : > { %v1238_v22 = vadd.f32 %v1237_v19, %v1236_v16  ;;  %v1119_v30 = vpop.permute.xlu1 %1118 }
 0x223   : > { %v1188_v56 = vmul.f32 %v1923_v42, %v1119_v30 }
 0x224   : > { %v1240_v50 = vadd.f32 %v1239_v29, %v1238_v22 }
 0x225   : > { %v1241_v47 = vsel %vm602_vm0, %v1188_v56, 0.0 }
 0x226   : > { %v1242_v13 = vadd.f32 %v1241_v47, %v1240_v50  ;;  %v1129_v25 = vpop.permute.xlu1 %1128  ;;  %v1358_v47 = vld [vmem:[%s2930_s5] sm:$0x1]  ;;  %s1938_s5 = scalar_lea.vmem %s1937_s0, 32 }
 0x227   : > { %v1190_v49 = vmul.f32 %v1925_v38, %v1129_v25  ;;  %v1360_v25 = vld [vmem:[%s2931_s6] sm:$0x1]  ;;  %v1446_v38 = vld [vmem:[%s2905_s9 + $0x8] sm:$0xff]  ;;  %p1940_p1 = scmp.lt.s32.totalorder %s1938_s5, %s1932_s21 }
 0x228   : > { %v1244_v3 = vadd.f32 %v1243_v5, %v1242_v13 }
 0x229   : > { %v1245_v46 = vsel %vm602_vm0, %v1190_v49, 0.0  ;;  %v1445_v49 = vld [vmem:[%s2905_s9] sm:$0xff]  ;;  %p1941_p2 = por %p1940_p1, %p1939_p0 }
 0x22a   : > { %v1246_v15 = vadd.f32 %v1245_v46, %v1244_v3  ;;  %v1139_v26 = vpop.permute.xlu1 %1138  ;;  %v1364_v3 = vld [vmem:[%s2904_s8] sm:$0x1] }
 0x22b   : > { %v1192_v53 = vmul.f32 %v1927_v18, %v1139_v26  ;;  %v1447_v26 = vld [vmem:[%s2906_s10] sm:$0x1]  ;;  %p1942_p3 = pnand %p1941_p2, %p1935_p13 }
 0x22c   : > { %v1248_v27 = vadd.f32 %v1247_v54, %v1246_v15 }
 0x22d   : > { %v1249_v28 = vsel %vm602_vm0, %v1192_v53, 0.0 }
 0x22e   : > { %v1250_v36 = vadd.f32 %v1249_v28, %v1248_v27  ;;  %v1149_v10 = vpop.permute.xlu1 %1148 }
 0x22f   : > { %v1194_v55 = vmul.f32 %v1929_v9, %v1149_v10  ;;  %v1536_v10 = vld [vmem:[%s2909_s13] sm:$0xf] }
 0x230   : > { %v1252_v40 = vadd.f32 %v1251_v31, %v1250_v36 }
 0x231   : > { %v1253_v24 = vsel %vm602_vm0, %v1194_v55, 0.0  ;;  %v1531_v55 = vld [vmem:[%s2907_s11] sm:$0x1] }
 0x232   : > { %v1254_v57 = vadd.f32 %v1253_v24, %v1252_v40  ;;  %v1159_v37 = vpop.permute.xlu1 %1158  ;;  %v1533_v40 = vld [vmem:[%s2908_s12] sm:$0x1] }
 0x233   : > { %v1196_v44 = vmul.f32 %v1931_v41, %v1159_v37 }
 0x234   : > { %v1256_v48 = vadd.f32 %v1255_v39, %v1254_v57 }
 0x235   : > { %v1257_v0 = vsel %vm602_vm0, %v1196_v44, 0.0 }
 0x236   : > { %v1258_v51 = vadd.f32 %v1257_v0, %v1256_v48 }
 0x238   : > { %v1260_v1 = vadd.f32 %v1259_v43, %v1258_v51 }
 0x23a   : > { %v1261_v7 = vrot.slane %v1260_v1, 4 }
 0x23c   : > { %v1262_v61 = vadd.f32 %v1261_v7, %v1260_v1 }
 0x23e   : > { %v1263_v45 = vrot.slane %v1262_v61, 2 }
 0x240   : > { %v1264_v63 = vadd.f32 %v1263_v45, %v1262_v61 }
 0x242   : > { %v1265_v8 = vrot.slane %v1264_v63, 1 }
 0x244   : > { %v1266_v2 = vadd.f32 %v1265_v8, %v1264_v63 }
 0x246   : > { %1762 = vmatmul.mubr.msk.f32.vlgmr.msra.gmra.mxu0 %vm602_vm0, %v1266_v2 }
 0x247   : > { %1778 = vmatprep.mubr.msk.f32.mxu0 %vm2026_vm2, %v2025_v12  ;;  %1777 = vmatpush3.msk.msra.mxu0 %vm1369_vm4, %v1536_v10 }
 0x306   : > { %v1339_v59 = vpop.f32.mrf.mxu0 }
 0x307   : > { %v1340_v11 = vadd.f32 %v1339_v59, %v1269_v62 }
 0x308   : > { %v1763_v17 = vpop.f32.mrf.mxu0 }
 0x309   : > { %v1344_v16 = vsel %vm1343_vm3, %v1340_v11, 0.0 }
 0x30a   : > { %1345 = vadd.xlane.f32.xlu1 %v1344_v16 }
 0x393   : > { %v1346_v19 = vpop.xlane.xlu1 %1345 }
 0x394   : > { %v1348_v22 = vmul.f32 0.25, %v1346_v19 }
 0x396   : > { %v1349_v30 = vsub.f32 %v1340_v11, %v1348_v22 }
 0x398   : > { %v1350_v29 = vmul.f32 %v1349_v30, %v1349_v30 }
 0x39a   : > { %v1351_v4 = vsel %vm1343_vm3, %v1350_v29, 0.0 }
 0x39b   : > { %1352 = vadd.xlane.f32.xlu0 %v1351_v4 }
 0x424   : > { %v1353_v42 = vpop.xlane.xlu0 %1352 }
 0x425   : > { %v1354_v56 = vmul.f32 0.25, %v1353_v42 }
 0x427   : > { %v1355_v21 = vadd.f32 1e-05, %v1354_v56 }
 0x429   : > { %1896 = vrsqrt.f32 %v1355_v21 }
 0x436   : > { %v1897_v50 = vpop.eup %1896 }
 0x437   : > { %v1357_v13 = vmul.f32 %v1897_v50, %v1349_v30 }
 0x439   : > { %v1359_v5 = vmul.f32 %v1358_v47, %v1357_v13 }
 0x43b   : > { %v1361_v34 = vadd.f32 %v1360_v25, %v1359_v5 }
 0x43d   : > { %v1362_v6 = vmax.f32 %v1361_v34, 0.0 }
 0x43f   : > { %1767 = vmatmul.mubr.msk.f32.vlgmr.msra.gmra.mxu1 %vm1365_vm5, %v1362_v6 }
 0x440   : > { %1770 = vmatpush3.msra.mxu1 %v1446_v38  ;;  %1773 = vmatprep.mubr.msk.f32.mxu1 %vm2026_vm2, %v2025_v12 }
 0x441   : > { %1771 = vmatprep.subr.mxu1 %v2025_v12 }
 0x442   : > { %1772 = vmatpush3.msra.mxu1 %v1445_v49 }
 0x443   : > { %1774 = vmatmul.mubr.msk.f32.vlgmr.msra.gmra.mxu1 %vm602_vm0, %v1266_v2 }
 0x4ff   : > { %v1439_v46 = vpop.f32.mrf.mxu1 }
 0x500   : > { %v1440_v14 = vadd.f32 %v1439_v46, %v1364_v3 }
 0x501   : > { %v1768_v15 = vpop.f32.mrf.mxu1 }
 0x502   : > { %1444 = vst.msk [vmem:[%s2913_s27] sm:$0x1] %vm1443_vm6, %v1440_v14 }
 0x503   : > { %v1514_v12 = vpop.f32.mrf.mxu1 }
 0x504   : > { %v1515_v54 = vadd.f32 %v1514_v12, %v1447_v26 }
 0x505   : > { %v1775_v52 = vpop.f32.mrf.mxu1 }
 0x506   : > { %v1518_v20 = vsel %vm1343_vm3, %v1515_v54, 0.0 }
 0x507   : > { %1519 = vadd.xlane.f32.xlu0 %v1518_v20 }
 0x590   : > { %v1520_v18 = vpop.xlane.xlu0 %1519 }
 0x591   : > { %v1521_v53 = vmul.f32 0.25, %v1520_v18 }
 0x593   : > { %v1522_v27 = vsub.f32 %v1515_v54, %v1521_v53 }
 0x595   : > { %v1523_v28 = vmul.f32 %v1522_v27, %v1522_v27 }
 0x597   : > { %v1524_v36 = vsel %vm1343_vm3, %v1523_v28, 0.0 }
 0x598   : > { %1525 = vadd.xlane.f32.xlu1 %v1524_v36 }
 0x621   : > { %v1526_v31 = vpop.xlane.xlu1 %1525 }
 0x622   : > { %v1527_v32 = vmul.f32 0.25, %v1526_v31 }
 0x624   : > { %v1528_v35 = vadd.f32 1e-05, %v1527_v32 }
 0x626   : > { %1898 = vrsqrt.f32 %v1528_v35 }
 0x633   : > { %v1899_v9 = vpop.eup %1898 }
 0x634   : > { %v1530_v58 = vmul.f32 %v1899_v9, %v1522_v27 }
 0x636   : > { %v1532_v24 = vmul.f32 %v1531_v55, %v1530_v58 }
 0x638   : > { %v1534_v57 = vadd.f32 %v1533_v40, %v1532_v24 }
 0x63a   : > { %v1535_v37 = vmax.f32 %v1534_v57, 0.0 }
 0x63c   : > { %1779 = vmatmul.mubr.msk.f32.vlgmr.msra.gmra.mxu0 %vm1365_vm5, %v1535_v37 }
 0x63d   : > { %1945 = shalt.err (!%p1942_p3)
}
 0x63e   : > { %s1946_s27 = scalar_lea.hbm %s1630_s1, 16  ;;  %s1950_s29 = scalar_lea.hbm %s2911_s15, 32 }
 0x63f   : > { %p1947_p4 = scmp.ne.s32.totalorder %s1630_s1, %s1946_s27  ;;  %p1951_p9 = scmp.lt.s32.totalorder %s1630_s1, %s2911_s15 }
 0x640   : > { %p1952_p10 = scmp.lt.s32.totalorder %s1950_s29, %s1946_s27 }
 0x641   : > { %p1948_p7 = pnand %p1947_p4, %p2155_p5 }
 0x642   : > { %p1953_p11 = por %p1952_p10, %p1951_p9 }
 0x643   : > { %p1949_p8 = pneg %p1948_p7 }
 0x645   : > { %p1954_p12 = pnand %p1953_p11, %p1949_p8 }
 0x647   : > { %1957 = shalt.err (!%p1954_p12)
}
 0x648   : > { %1781 = dma.vmem_to_hbm [thread:$0]  (%p2155_p5), %s1633_s4, 16, %s1630_s1, %s1616_s20   ;;  %v1537_v39 = vld [vmem:[%s2910_s14] sm:$0x1] }
 0x649   : > { %s525_s22 = scalar_lea.vmem [#allocation5], %s2804_s19  ;;  %s2933_s6 = sshll.u32 %s2138_s2, 4 }
 0x64a   : > { %s1645_s0 = sshll.u32 %s525_s22, 4  ;;  %s2859_s27 = scalar_lea.hbm %s2912_s16, %s2933_s6  ;;  %s1646_s0 = int_to_ptr.vmem [resolvable:$true] %s1645_s0 }
 0x64b   : > { %s1620_s3 = scalar_lea.sflag [#allocation6], %s2804_s19  ;;  %s1958_s1 = scalar_lea.vmem %s1646_s0, 16 }
 0x64c   : > { %p1959_p13 = scmp.ne.s32.totalorder %s1646_s0, %s1958_s1  ;;  %s2028_s4 = smov [#allocation5]  }
 0x64d   : > { %s1962_s20 = sshll.u32 %s2028_s4, 4  ;;  %s1963_s20 = int_to_ptr.vmem [resolvable:$false] %s1962_s20 }
 0x64e   : > { %p1960_p0 = pnand %p1959_p13, %p2155_p5  ;;  %s1964_s30 = scalar_lea.vmem %s1963_s20, 32 }
 0x64f   : > { %p1965_p2 = scmp.lt.s32.totalorder %s1646_s0, %s1963_s20  ;;  %p1966_p3 = scmp.lt.s32.totalorder %s1964_s30, %s1958_s1 }
 0x650   : > { %p1961_p1 = pneg %p1960_p0 }
 0x651   : > { %p1967_p4 = por %p1966_p3, %p1965_p2 }
 0x653   : > { %p1968_p7 = pnand %p1967_p4, %p1961_p1 }
 0x6fc   : > { %v1610_v23 = vpop.f32.mrf.mxu0 }
 0x6fd   : > { %v1611_v60 = vadd.f32 %v1610_v23, %v1537_v39 }
 0x6fe   : > { %v1780_v41 = vpop.f32.mrf.mxu0 }
 0x6ff   : > { %1614 = vst.msk [vmem:[%s525_s22] sm:$0x1] %vm1443_vm6, %v1611_v60 }
 0x700   : > { %1971 = shalt.err (!%p1968_p7)
}
 0x701   : > { %s1972_s2 = scalar_lea.hbm %s2859_s27, 16  ;;  %s1976_s21 = scalar_lea.hbm %s2912_s16, 32 }
 0x702   : > { %p1973_p8 = scmp.ne.s32.totalorder %s2859_s27, %s1972_s2  ;;  %p1977_p11 = scmp.lt.s32.totalorder %s2859_s27, %s2912_s16 }
 0x703   : > { %p1978_p12 = scmp.lt.s32.totalorder %s1976_s21, %s1972_s2 }
 0x704   : > { %p1974_p9 = pnand %p1973_p8, %p2155_p5 }
 0x705   : > { %p1979_p13 = por %p1978_p12, %p1977_p11 }
 0x706   : > { %p1975_p10 = pneg %p1974_p9 }
 0x708   : > { %p1980_p0 = pnand %p1979_p13, %p1975_p10 }
 0x70a   : > { %1983 = shalt.err (!%p1980_p0)
}
 0x70b   : > { %1782 = dma.vmem_to_hbm [thread:$0]  (%p2155_p5), %s1646_s0, 16, %s2859_s27, %s1620_s3  }
 0x70c PF: > { %p1792_p1 = scmp.ge.s32.totalorder %s2022_s26, 2  ;;  %s1657_s7 = sand.u32 1, %s2010_s23  }
 0x70d   : > { %s1658_s29 = scalar_lea.sflag [#allocation4], %s1657_s7 }
 0x70e   : > { %p1786_p2 = pnand %p1792_p1, %p2159_p6 }
 0x710   : > { %p1787_p3 = pneg %p1786_p2 }
 0x712   : > { %2001 = dma.done.wait (%p1787_p3), %s1658_s29, 16  }
 0x713   : > { %2003 = vsyncadd (%p1787_p3), %s1658_s29, 4294967280  ;;  %s1666_s1 = scalar_lea.sflag [#allocation6], %s1657_s7 }
 0x714   : > { %2005 = dma.done.wait (%p1787_p3), %s1666_s1, 16  }
 0x715   : > { %2007 = vsyncadd (%p1787_p3), %s1666_s1, 4294967280  ;;  %s2934_s17 = sld [smem:[#allocation9_spill]]  ;;  %p32_p5 = scmp.ge.s32.totalorder %s2142_s28, 4  }
 0x716   : > { %s2935_s23 = smov %s2014_s24  ;;  %s2936_s24 = smov %s2018_s25 }
 0x717   : > { %s2938_s26 = smov %s2142_s28  ;;  %34 = sbr.rel (!%p32_p5) target bundleno = 13 (0xd), region = 132 }
 0x71b   : > { %s2937_s25 = smov %s2934_s17 }
 0x71c   :  { %1670 = vsyncpa [#allocation4], 1 }
 0x71d   :  { %1672 = vsyncpa [#allocation4 + $0x1], 1 }
 0x71e   :  { %1673 = vsyncpa [#allocation6], 1 }
 0x71f   :  { %1675 = vsyncpa [#allocation6 + $0x1], 1 }

</bundles_post_ra>
